<compile_context>
chip_gen: v7x
topology: tpu7x:2x2x1
jax: 0.10.0
libtpu: 0.0.40
codegen_flags: <defaults>
</compile_context>

<pallas_src>
import math

import jax
import jax.numpy as jnp
from jax.experimental import pallas as pl
from jax.experimental.pallas import tpu as pltpu


def _round_up(v, m):
    return (v + m - 1) // m * m


# ----------------------------------------------------------------------------
# Graph preprocessing (dense mirror of _prepare_prop / _adj_norm, done once)
# ----------------------------------------------------------------------------

def _indicator(m):
    return (m > 0).astype(jnp.float32)


def _adj_norm(a):
    # D^{-1/2} A D^{-1/2}, rows with zero degree -> 0 (matches isinf -> 0)
    d = jnp.sum(a, axis=1)
    d_inv_sqrt = jnp.where(d > 0, jax.lax.rsqrt(jnp.maximum(d, 1e-12)), 0.0)
    return a * d_inv_sqrt[:, None] * d_inv_sqrt[None, :]


def prepare_prop(adj):
    n = adj.shape[0]
    eye = jnp.eye(n, dtype=jnp.float32)
    a1 = _indicator(adj - eye)
    a2 = _indicator(adj @ adj - adj - eye)
    return _adj_norm(a1), _adj_norm(a2)


# ----------------------------------------------------------------------------
# Pallas kernel
# ----------------------------------------------------------------------------

def _h2gcn_conv_kernel(xr_ref, xk_ref, a1_ref, a2_ref, w_ref, b_ref,
                       o_ref, acc1_ref, acc2_ref):
    k = pl.program_id(1)

    @pl.when(k == 0)
    def _init():
        acc1_ref[...] = jnp.zeros_like(acc1_ref)
        acc2_ref[...] = jnp.zeros_like(acc2_ref)

    # Streamed bf16 contraction tile of X; bf16 adjacency tiles; f32 MXU acc.
    xk = xk_ref[...]                                            # (blk_k, F)
    acc1_ref[...] += jnp.dot(a1_ref[...], xk,
                             preferred_element_type=jnp.float32)
    acc2_ref[...] += jnp.dot(a2_ref[...], xk,
                             preferred_element_type=jnp.float32)

    @pl.when(k == pl.num_programs(1) - 1)
    def _finalize():
        # Single fused projection: LHS = [x_rows | a1@x | a2@x] (blk_m, 3F)
        # against the block-diagonal (3F, P) bf16 weight slab -> one K=3F
        # MXU call, lane-dense (blk_m, P) output, no lane-axis concat of the
        # three activations.
        lhs = jnp.concatenate(
            [xr_ref[...],
             acc1_ref[...].astype(jnp.bfloat16),
             acc2_ref[...].astype(jnp.bfloat16)], axis=-1)
        y = jnp.dot(lhs, w_ref[...], preferred_element_type=jnp.float32)
        o_ref[...] = jnp.maximum(y + b_ref[...], 0.0)


# ----------------------------------------------------------------------------
# pallas_call wrapper
# ----------------------------------------------------------------------------

def _conv_pallas(x, a1n, a2n, w0, b0, w1, b1, w2, b2, *, blk_m=256, blk_k=512):
    n, f = x.shape
    h0, h1d, h2d = w0.shape[1], w1.shape[1], w2.shape[1]
    out_dim = h0 + h1d + h2d
    p = _round_up(out_dim, 128)                 # lane-dense output width

    # Clamp tiles to the (128-aligned) problem size; keep them 128-aligned.
    n128 = _round_up(n, 128)
    blk_m = min(blk_m, n128)
    blk_k = min(blk_k, n128)
    assert blk_m % 128 == 0 and blk_k % 128 == 0
    n_pad = _round_up(n, math.lcm(blk_m, blk_k))

    # Zero-pad the node dimension (zero rows/cols are inert); bf16 operands
    # for the HBM-dominant streams, f32 accumulation in-kernel.
    x_bf = jnp.pad(x, ((0, n_pad - n), (0, 0))).astype(jnp.bfloat16)
    a1_p = jnp.pad(a1n, ((0, n_pad - n), (0, n_pad - n))).astype(jnp.bfloat16)
    a2_p = jnp.pad(a2n, ((0, n_pad - n), (0, n_pad - n))).astype(jnp.bfloat16)

    # Fused block-diagonal projection slab: row blocks [0:F)/[F:2F)/[2F:3F)
    # hold W0/W1/W2 in disjoint lane ranges of the 128-padded output.
    w_slab = jnp.zeros((3 * f, p), jnp.float32)
    w_slab = w_slab.at[:f, :h0].set(w0)
    w_slab = w_slab.at[f:2 * f, h0:h0 + h1d].set(w1)
    w_slab = w_slab.at[2 * f:, h0 + h1d:out_dim].set(w2)
    w_slab = w_slab.astype(jnp.bfloat16)
    bcat = jnp.zeros((1, p), jnp.float32).at[:, :out_dim].set(
        jnp.concatenate([b0, b1, b2], axis=1))

    gi = n_pad // blk_m
    gk = n_pad // blk_k

    # Explicit VMEM budget (double buffers) -> limit with headroom, capped so
    # the same tiling also fits v7x's 64 MiB physical VMEM.
    vmem_need = (2 * 2 * blk_m * blk_k * 2      # a1 + a2 tiles (bf16)
                 + 2 * blk_k * f * 2            # streamed x contraction tile
                 + 2 * blk_m * f * 2            # x row tile
                 + 2 * 3 * f * p * 2            # weight slab
                 + 2 * p * 4                    # bias
                 + 2 * blk_m * p * 4            # output tile
                 + 2 * blk_m * f * 4)           # f32 accumulators
    vmem_limit = int(min(max(4 * vmem_need, 16 * 1024 * 1024),
                         48 * 1024 * 1024))

    cost = pl.CostEstimate(
        flops=4 * n_pad * n_pad * f + 2 * n_pad * 3 * f * p,
        transcendentals=0,
        bytes_accessed=(2 * n_pad * n_pad * 2          # a1 + a2 (bf16)
                        + (gi + 1) * n_pad * f * 2     # streamed + row X
                        + n_pad * p * 4                # output
                        + 3 * f * p * 2 + p * 4),      # weights + bias
    )

    out = pl.pallas_call(
        _h2gcn_conv_kernel,
        out_shape=jax.ShapeDtypeStruct((n_pad, p), jnp.float32),
        grid=(gi, gk),
        in_specs=[
            pl.BlockSpec((blk_m, f), lambda i, k: (i, 0)),      # x rows (W0)
            pl.BlockSpec((blk_k, f), lambda i, k: (k, 0)),      # x contraction
            pl.BlockSpec((blk_m, blk_k), lambda i, k: (i, k)),  # a1 tile
            pl.BlockSpec((blk_m, blk_k), lambda i, k: (i, k)),  # a2 tile
            pl.BlockSpec((3 * f, p), lambda i, k: (0, 0)),      # fused weights
            pl.BlockSpec((1, p), lambda i, k: (0, 0)),          # fused bias
        ],
        out_specs=pl.BlockSpec((blk_m, p), lambda i, k: (i, 0)),
        scratch_shapes=[pltpu.VMEM((blk_m, f), jnp.float32),
                        pltpu.VMEM((blk_m, f), jnp.float32)],
        compiler_params=pltpu.CompilerParams(
            dimension_semantics=("parallel", "arbitrary"),
            vmem_limit_bytes=vmem_limit,
        ),
        cost_estimate=cost,
    )(x_bf, x_bf, a1_p, a2_p, w_slab, bcat)

    return out[:n, :out_dim]


def h2gcn_conv_forward(x, adj, params, *, blk_m=256, blk_k=512):
    """Full H2GCN_conv forward: one-time graph prep + fused Pallas conv."""
    a1n, a2n = prepare_prop(adj)
    return _conv_pallas(x, a1n, a2n,
                        params["w0"], params["b0"],
                        params["w1"], params["b1"],
                        params["w2"], params["b2"],
                        blk_m=blk_m, blk_k=blk_k)


# ----------------------------------------------------------------------------
# Main
# ----------------------------------------------------------------------------

if __name__ == "__main__":
    # Small-but-nontrivial: N=384 pads to 512 so blk_m=128 / blk_k=256 give a
    # 4x2 grid (exercises padding, the k accumulation loop and both axes).
    N, in_dim, out_dim = 384, 64, 48

    key = jax.random.PRNGKey(0)
    k_adj, k_x, k0, k1, k2, k3, k4, k5 = jax.random.split(key, 8)

    # deterministic symmetric 0/1 adjacency, no self-loops
    rnd = jax.random.uniform(k_adj, (N, N))
    upper = (jnp.triu(rnd, k=1) > 0.9).astype(jnp.float32)
    adj = upper + upper.T

    x = jax.random.normal(k_x, (N, in_dim), dtype=jnp.float32)

    # nn.Linear-style params stored (in, out); bias (1, out)
    h_split = out_dim // 3
    h0 = out_dim - 2 * h_split
    stdv = 1.0 / math.sqrt(in_dim)

    def u(k, shape):
        return jax.random.uniform(k, shape, jnp.float32, minval=-stdv, maxval=stdv)

    params = {
        "w0": u(k0, (in_dim, h0)),      "b0": u(k1, (1, h0)),
        "w1": u(k2, (in_dim, h_split)), "b1": u(k3, (1, h_split)),
        "w2": u(k4, (in_dim, h_split)), "b2": u(k5, (1, h_split)),
    }

    out = jax.block_until_ready(
        h2gcn_conv_forward(x, adj, params, blk_m=128, blk_k=256))
    assert out.shape == (N, out_dim)

    # plain-JAX f32 reference; kernel uses bf16 operands + f32 accumulation,
    # so tolerance is a few bf16 ulps of the O(1) activations (tightened
    # from 1e-1 to 5e-2 per review).
    a1n, a2n = prepare_prop(adj)
    r0 = jnp.maximum(x @ params["w0"] + params["b0"], 0.0)
    r1 = jnp.maximum((a1n @ x) @ params["w1"] + params["b1"], 0.0)
    r2 = jnp.maximum((a2n @ x) @ params["w2"] + params["b2"], 0.0)
    ref = jnp.concatenate([r0, r1, r2], axis=1)
    max_err = float(jnp.max(jnp.abs(out - ref)))
    assert max_err < 5e-2, f"max abs err {max_err}"

    print("KERNEL_OK")
</pallas_src>

<mosaic_0001>
module attributes {stable_mosaic.version = 11 : i64} {
  func.func @_h2gcn_conv_kernel(%arg0: i32, %arg1: i32, %arg2: memref<128x64xbf16, #tpu.memory_space<vmem>>, %arg3: memref<256x64xbf16, #tpu.memory_space<vmem>>, %arg4: memref<128x256xbf16, #tpu.memory_space<vmem>>, %arg5: memref<128x256xbf16, #tpu.memory_space<vmem>>, %arg6: memref<192x128xbf16, #tpu.memory_space<vmem>>, %arg7: memref<1x128xf32, #tpu.memory_space<vmem>>, %arg8: memref<128x128xf32, #tpu.memory_space<vmem>>, %arg9: memref<128x64xf32, #tpu.memory_space<vmem>>, %arg10: memref<128x64xf32, #tpu.memory_space<vmem>>) attributes {dimension_semantics = [#tpu.dimension_semantics<parallel>, #tpu.dimension_semantics<arbitrary>], iteration_bounds = array<i64: 4, 2>, scalar_prefetch = 0 : i64, scratch_operands = 2 : i64, tpu.core_type = #tpu.core_type<tc>, window_params = [{transform_indices = @transform_0, window_bounds = array<i64: 128, 64>}, {transform_indices = @transform_1, window_bounds = array<i64: 256, 64>}, {transform_indices = @transform_2, window_bounds = array<i64: 128, 256>}, {transform_indices = @transform_3, window_bounds = array<i64: 128, 256>}, {pipeline_mode = #tpu.pipeline_mode<synchronous>, transform_indices = @transform_4, window_bounds = array<i64: 192, 128>}, {pipeline_mode = #tpu.pipeline_mode<synchronous>, transform_indices = @transform_5, window_bounds = array<i64: 1, 128>}, {transform_indices = @transform_6, window_bounds = array<i64: 128, 128>}]} {
    %c0_i32 = arith.constant 0 : i32
    %0 = arith.cmpi eq, %arg1, %c0_i32 : i32
    %1 = arith.extui %0 : i1 to i32
    %c0_i32_0 = arith.constant 0 : i32
    %2 = arith.cmpi ne, %1, %c0_i32_0 : i32
    scf.if %2 {
      %cst_16 = arith.constant 0.000000e+00 : f32
      %17 = vector.broadcast %cst_16 : f32 to vector<128x64xf32>
      %c0_17 = arith.constant 0 : index
      %c0_18 = arith.constant 0 : index
      %18 = vector.load %arg9[%c0_17, %c0_18] : memref<128x64xf32, #tpu.memory_space<vmem>>, vector<128x64xf32>
      tpu.vector_store %arg9[%c0_17, %c0_18], %17 {strides = array<i32>} : memref<128x64xf32, #tpu.memory_space<vmem>>, vector<128x64xf32>,
      %cst_19 = arith.constant 0.000000e+00 : f32
      %19 = vector.broadcast %cst_19 : f32 to vector<128x64xf32>
      %c0_20 = arith.constant 0 : index
      %c0_21 = arith.constant 0 : index
      %20 = vector.load %arg10[%c0_20, %c0_21] : memref<128x64xf32, #tpu.memory_space<vmem>>, vector<128x64xf32>
      tpu.vector_store %arg10[%c0_20, %c0_21], %19 {strides = array<i32>} : memref<128x64xf32, #tpu.memory_space<vmem>>, vector<128x64xf32>,
    } else {
    }
    %c0 = arith.constant 0 : index
    %c0_1 = arith.constant 0 : index
    %3 = vector.load %arg3[%c0, %c0_1] : memref<256x64xbf16, #tpu.memory_space<vmem>>, vector<256x64xbf16>
    %c0_2 = arith.constant 0 : index
    %c0_3 = arith.constant 0 : index
    %4 = vector.load %arg9[%c0_2, %c0_3] : memref<128x64xf32, #tpu.memory_space<vmem>>, vector<128x64xf32>
    %c0_4 = arith.constant 0 : index
    %c0_5 = arith.constant 0 : index
    %5 = vector.load %arg4[%c0_4, %c0_5] : memref<128x256xbf16, #tpu.memory_space<vmem>>, vector<128x256xbf16>
    %cst = arith.constant dense<0.000000e+00> : vector<128x64xf32>
    %6 = tpu.matmul %5, %3, %cst {dimension_numbers = #tpu.dot_dimension_numbers<[1], [0], [0], [1], [0, 0, 1, 1], [], []>} : vector<128x256xbf16>, vector<256x64xbf16>, vector<128x64xf32> -> vector<128x64xf32>
    %7 = arith.addf %4, %6 : vector<128x64xf32>
    %c0_6 = arith.constant 0 : index
    %c0_7 = arith.constant 0 : index
    %8 = vector.load %arg9[%c0_6, %c0_7] : memref<128x64xf32, #tpu.memory_space<vmem>>, vector<128x64xf32>
    tpu.vector_store %arg9[%c0_6, %c0_7], %7 {strides = array<i32>} : memref<128x64xf32, #tpu.memory_space<vmem>>, vector<128x64xf32>,
    %c0_8 = arith.constant 0 : index
    %c0_9 = arith.constant 0 : index
    %9 = vector.load %arg10[%c0_8, %c0_9] : memref<128x64xf32, #tpu.memory_space<vmem>>, vector<128x64xf32>
    %c0_10 = arith.constant 0 : index
    %c0_11 = arith.constant 0 : index
    %10 = vector.load %arg5[%c0_10, %c0_11] : memref<128x256xbf16, #tpu.memory_space<vmem>>, vector<128x256xbf16>
    %cst_12 = arith.constant dense<0.000000e+00> : vector<128x64xf32>
    %11 = tpu.matmul %10, %3, %cst_12 {dimension_numbers = #tpu.dot_dimension_numbers<[1], [0], [0], [1], [0, 0, 1, 1], [], []>} : vector<128x256xbf16>, vector<256x64xbf16>, vector<128x64xf32> -> vector<128x64xf32>
    %12 = arith.addf %9, %11 : vector<128x64xf32>
    %c0_13 = arith.constant 0 : index
    %c0_14 = arith.constant 0 : index
    %13 = vector.load %arg10[%c0_13, %c0_14] : memref<128x64xf32, #tpu.memory_space<vmem>>, vector<128x64xf32>
    tpu.vector_store %arg10[%c0_13, %c0_14], %12 {strides = array<i32>} : memref<128x64xf32, #tpu.memory_space<vmem>>, vector<128x64xf32>,
    %c1_i32 = arith.constant 1 : i32
    %14 = arith.cmpi eq, %arg1, %c1_i32 : i32
    %15 = arith.extui %14 : i1 to i32
    %c0_i32_15 = arith.constant 0 : i32
    %16 = arith.cmpi ne, %15, %c0_i32_15 : i32
    scf.if %16 {
      %c0_16 = arith.constant 0 : index
      %c0_17 = arith.constant 0 : index
      %17 = vector.load %arg2[%c0_16, %c0_17] : memref<128x64xbf16, #tpu.memory_space<vmem>>, vector<128x64xbf16>
      %c0_18 = arith.constant 0 : index
      %c0_19 = arith.constant 0 : index
      %18 = vector.load %arg9[%c0_18, %c0_19] : memref<128x64xf32, #tpu.memory_space<vmem>>, vector<128x64xf32>
      %19 = arith.truncf %18 : vector<128x64xf32> to vector<128x64xbf16>
      %c0_20 = arith.constant 0 : index
      %c0_21 = arith.constant 0 : index
      %20 = vector.load %arg10[%c0_20, %c0_21] : memref<128x64xf32, #tpu.memory_space<vmem>>, vector<128x64xf32>
      %21 = arith.truncf %20 : vector<128x64xf32> to vector<128x64xbf16>
      %22 = tpu.concatenate %17, %19, %21 in 1 : vector<128x64xbf16>, vector<128x64xbf16>, vector<128x64xbf16> -> vector<128x192xbf16>
      %c0_22 = arith.constant 0 : index
      %c0_23 = arith.constant 0 : index
      %23 = vector.load %arg6[%c0_22, %c0_23] : memref<192x128xbf16, #tpu.memory_space<vmem>>, vector<192x128xbf16>
      %cst_24 = arith.constant dense<0.000000e+00> : vector<128x128xf32>
      %24 = tpu.matmul %22, %23, %cst_24 {dimension_numbers = #tpu.dot_dimension_numbers<[1], [0], [0], [1], [0, 0, 1, 1], [], []>} : vector<128x192xbf16>, vector<192x128xbf16>, vector<128x128xf32> -> vector<128x128xf32>
      %c0_25 = arith.constant 0 : index
      %c0_26 = arith.constant 0 : index
      %25 = vector.load %arg7[%c0_25, %c0_26] : memref<1x128xf32, #tpu.memory_space<vmem>>, vector<1x128xf32>
      %26 = vector.broadcast %25 : vector<1x128xf32> to vector<128x128xf32>
      %27 = arith.addf %24, %26 : vector<128x128xf32>
      %cst_27 = arith.constant 0.000000e+00 : f32
      %28 = vector.broadcast %cst_27 : f32 to vector<128x128xf32>
      %29 = arith.maximumf %27, %28 : vector<128x128xf32>
      %c0_28 = arith.constant 0 : index
      %c0_29 = arith.constant 0 : index
      %30 = vector.load %arg8[%c0_28, %c0_29] : memref<128x128xf32, #tpu.memory_space<vmem>>, vector<128x128xf32>
      tpu.vector_store %arg8[%c0_28, %c0_29], %29 {strides = array<i32>} : memref<128x128xf32, #tpu.memory_space<vmem>>, vector<128x128xf32>,
    } else {
    }
    return
  }
  func.func @transform_0(%arg0: i32, %arg1: i32) -> (i32, i32) {
    %c0_i32 = arith.constant 0 : i32
    %c0_i32_0 = arith.constant 0 : i32
    return %arg0, %c0_i32 : i32, i32
  }
  func.func @transform_1(%arg0: i32, %arg1: i32) -> (i32, i32) {
    %c0_i32 = arith.constant 0 : i32
    %c0_i32_0 = arith.constant 0 : i32
    return %arg1, %c0_i32 : i32, i32
  }
  func.func @transform_2(%arg0: i32, %arg1: i32) -> (i32, i32) {
    %c0_i32 = arith.constant 0 : i32
    return %arg0, %arg1 : i32, i32
  }
  func.func @transform_3(%arg0: i32, %arg1: i32) -> (i32, i32) {
    %c0_i32 = arith.constant 0 : i32
    return %arg0, %arg1 : i32, i32
  }
  func.func @transform_4(%arg0: i32, %arg1: i32) -> (i32, i32) {
    %c0_i32 = arith.constant 0 : i32
    %c0_i32_0 = arith.constant 0 : i32
    %c0_i32_1 = arith.constant 0 : i32
    return %c0_i32, %c0_i32_0 : i32, i32
  }
  func.func @transform_5(%arg0: i32, %arg1: i32) -> (i32, i32) {
    %c0_i32 = arith.constant 0 : i32
    %c0_i32_0 = arith.constant 0 : i32
    %c0_i32_1 = arith.constant 0 : i32
    return %c0_i32, %c0_i32_0 : i32, i32
  }
  func.func @transform_6(%arg0: i32, %arg1: i32) -> (i32, i32) {
    %c0_i32 = arith.constant 0 : i32
    %c0_i32_0 = arith.constant 0 : i32
    return %arg0, %c0_i32 : i32, i32
  }
}

</mosaic_0001>

<bundles_post_ra>
// kernel: tpu_custom_call.1
= control target key start
LH: loop header
LB: loop body
LE: loop exit
PB: predicated region body
PF: predicated region fallthrough
CT: control target
= control target key end

     0   :  { %s2846_s0 = inlined_call_operand.vmem [shape: bf16[512,64], index: 0, kind: input, shape index: {}]   ;;  %s2847_s1 = inlined_call_operand.vmem [shape: bf16[512,64], index: 1, kind: input, shape index: {}]   ;;  %s2848_s2 = inlined_call_operand.hbm [shape: bf16[512,512], index: 2, kind: input, shape index: {}]   ;;  %s2849_s3 = inlined_call_operand.hbm [shape: bf16[512,512], index: 3, kind: input, shape index: {}]   ;;  %s2850_s4 = inlined_call_operand.vmem [shape: bf16[192,128], index: 4, kind: input, shape index: {}]   ;;  %s2851_s5 = inlined_call_operand.vmem [shape: f32[1,128], index: 5, kind: input, shape index: {}]   ;;  %s2852_s6 = inlined_call_operand.hbm [shape: f32[512,128], index: 6, kind: output, shape index: {}]  }
   0x1   :  { %2864 = sst [smem:[#allocation22_spill]] %s2848_s2 }
   0x2   :  { %11 = vsyncpa [#allocation5], 0 }
   0x3   :  { %13 = vsyncpa [#allocation5 + $0x1], 0 }
   0x4   :  { %14 = vsyncpa [#allocation8], 0 }
   0x5   :  { %16 = vsyncpa [#allocation8 + $0x1], 0 }
   0x6   :  { %17 = vsyncpa [#allocation6], 0 }
   0x7   :  { %19 = vsyncpa [#allocation6 + $0x1], 0  ;;  %s2295_s21 = smov 0   ;;  %s2297_s22 = smov 0  }
   0x8   :  { %s2299_s23 = smov 0   ;;  %s2301_s24 = smov 0  }
   0x9   :  { %s2303_s25 = smov 0   ;;  %s2305_s26 = smov 0  }
   0xa   :  { %s2307_s27 = smov 0   ;;  %s2309_s28 = smov 0  }
   0xb   :  { %s2311_s29 = smov 0   ;;  %s2313_s30 = smov 0  }
   0xc   :  { %s2315_s7 = smov 0  }
   0xd LB: > { %2865 = sst [smem:[#allocation13_spill]] %s2215_s23  ;;  %s1601_s8 = sadd.s32 4294967295, %s2247_s7   ;;  %s2247_s7 = sphi %s2315_s7, %s25_s7   ;;  %s2243_s30 = sphi %s2313_s30, %s2896_s30   ;;  %s2239_s29 = sphi %s2311_s29, %s2895_s29   ;;  %s2235_s28 = sphi %s2309_s28, %s2894_s28   ;;  %s2231_s27 = sphi %s2307_s27, %s2893_s27   ;;  %s2227_s26 = sphi %s2305_s26, %s2892_s26   ;;  %s2223_s25 = sphi %s2303_s25, %s2900_s25   ;;  %s2219_s24 = sphi %s2301_s24, %s2899_s24   ;;  %s2215_s23 = sphi %s2299_s23, %s2890_s23   ;;  %s2211_s22 = sphi %s2297_s22, %s2898_s22   ;;  %s2207_s21 = sphi %s2295_s21, %s2897_s21  }
   0xe   : > { %2866 = sst [smem:[#allocation14_spill]] %s2227_s26  ;;  %s1602_s9 = sadd.s32 4294967294, %s2247_s7  }
   0xf   : > { %2867 = sst [smem:[#allocation15_spill]] %s2239_s29  ;;  %s34_s10 = sadd.s32 1, %s2239_s29 }
  0x10   : > { %2868 = sst [smem:[#allocation16_spill]] %s2243_s30  ;;  %s37_s11 = sadd.s32 1, %s2243_s30 }
  0x11   : > { %p35_p0 = scmp.ge.s32.totalorder %s34_s10, 2  ;;  %s98_s12 = sadd.s32 1, %s2227_s26 }
  0x12   : > { %p105_p1 = scmp.ne.s32.totalorder %s2227_s26, %s2223_s25  ;;  %p106_p2 = scmp.eq.s32.totalorder %s2247_s7, 0 }
  0x13   : > { %s2902_s10 = smov (%p35_p0, %s34_s10), 0  ;;  %s2904_s11 = smov (!%p35_p0, %s37_s11), %s2243_s30 }
  0x14   : > { %2869 = sst [smem:[#allocation17_spill]] %s2902_s10  ;;  %s94_s13 = ssub.s32 %s2239_s29, %s2902_s10 }
  0x15   : > { %p2361_p3 = por %p106_p2, %p105_p1  ;;  %p39_p4 = scmp.ge.s32.totalorder %s2904_s11, 4 }
  0x16   : > { %p111_p5 = scmp.ne.s32.totalorder %s2223_s25, %s2219_s24  ;;  %p112_p6 = scmp.eq.s32.totalorder %s1601_s8, 0 }
  0x17   : > { %s194_s15 = sadd.s32 1, %s2215_s23  ;;  %s2906_s11 = smov (%p39_p4, %s2904_s11), 0 }
  0x18   : > { %2871 = sst [smem:[#allocation18_spill]] %s2906_s11  ;;  %p2369_p7 = por %p112_p6, %p111_p5 }
  0x19   : > { %p204_p8 = scmp.ne.s32.totalorder %s2215_s23, %s2211_s22  ;;  %s93_s17 = ssub.s32 %s2243_s30, %s2906_s11 }
  0x1a   : > { %s2872_s16 = scalar_select %p2369_p7, 1, 0 }
  0x1b   : > { %p205_p9 = scmp.eq.s32.totalorder %s1601_s8, 7  ;;  %s95_s18 = sor.u32 %s94_s13, %s93_s17 }
  0x1c   : > { %p192_p10 = scmp.eq.s32.totalorder %s93_s17, 0  ;;  %p96_p11 = scmp.eq.s32.totalorder %s95_s18, 0 }
  0x1d   : > { %p2377_p12 = por %p205_p9, %p204_p8  ;;  %p210_p13 = scmp.ne.s32.totalorder %s2211_s22, %s2207_s21 }
  0x1e   : > { %s2382_s20 = scalar_select %p192_p10, %s2215_s23, %s194_s15  }
  0x1f   : > { %s2873_s19 = scalar_select %p2377_p12, 1, 0 }
  0x20   : > { %2874 = sst [smem:[#allocation19_spill]] %s2382_s20  ;;  %p211_p0 = scmp.eq.s32.totalorder %s1602_s9, 7 }
  0x21   : > { %s2385_s24 = scalar_select %p96_p11, %s2227_s26, %s98_s12  }
  0x22   : > { %p1879_p1 = scmp.lt.s32.totalorder %s2247_s7, 8  ;;  %p2390_p2 = por %p211_p0, %p210_p13 }
  0x23   : > { %2875 = sst [smem:[#allocation20_spill]] %s2385_s24  ;;  %s2395_s8 = sand.u32 1, %s2227_s26  }
  0x24   : > { %s2876_s10 = scalar_select %p2390_p2, 1, 0 }
  0x25   : > { %s2856_s13 = sshll.u32 %s2395_s8, 7  ;;  %s1607_s17 = sshll.u32 %s2239_s29, 1 }
  0x26   : > { %2877 = sst [smem:[#allocation21_spill]] %s2876_s10  ;;  %s1707_s18 = sshll.u32 %s2243_s30, 6 }
  0x27   : > { %s259_s15 = scalar_lea.vmem [#allocation4], %s2856_s13  ;;  %s2402_s11 = sadd.s32 %s1707_s18, %s1607_s17 }
  0x28   : > { %s269_s12 = sshll.u32 %s259_s15, 4  ;;  %s2857_s9 = sshll.u32 %s2402_s11, 6  ;;  %s2404_s12 = int_to_ptr.vmem [resolvable:$true] %s269_s12 }
  0x29   : > { %p2409_p4 = pnand %p1879_p1, %p2361_p3  ;;  %s2879_s2 = sld [smem:[#allocation22_spill]] }
  0x2b   : > { %p2063_p3 = pneg %p2409_p4 }
  0x2f   : > { %s2418_s13 = scalar_lea.hbm %s2879_s2, %s2857_s9  ;;  %s2066_s20 = scalar_lea.hbm %s2879_s2, 16384 }
  0x30   : > { %s2061_s18 = scalar_lea.hbm %s2418_s13, 2048  ;;  %p2067_p10 = scmp.lt.u32.totalorder %s2418_s13, %s2879_s2 }
  0x31   : > { %p2062_p6 = scmp.ne.s32.totalorder %s2418_s13, %s2061_s18  ;;  %p2068_p11 = scmp.lt.u32.totalorder %s2066_s20, %s2061_s18 }
  0x32   : > { %p2070_p0 = scmp.lt.u32.totalorder %s2061_s18, %s2418_s13 }
  0x33   : > { %p2064_p8 = pnand %p2063_p3, %p2062_p6  ;;  %p2069_p13 = por %p2068_p11, %p2067_p10 }
  0x35   : > { %p2065_p9 = pneg %p2064_p8  ;;  %p2071_p1 = por %p2070_p0, %p2069_p13 }
  0x37   : > { %p2072_p5 = pnand %p2071_p1, %p2065_p9 }
  0x39   : > { %2075 = shalt.err (!%p2072_p5)
}
  0x3a   : > { %s2076_s17 = scalar_lea.vmem %s2404_s12, 2048  ;;  %s2249_s14 = smov [#allocation4]  }
  0x3b   : > { %p2077_p6 = scmp.ne.s32.totalorder %s2404_s12, %s2076_s17  ;;  %s2081_s26 = sshll.u32 %s2249_s14, 4  ;;  %s2082_s26 = int_to_ptr.vmem [resolvable:$false] %s2081_s26 }
  0x3c   : > { %s2083_s9 = scalar_lea.vmem %s2082_s26, 4096  ;;  %p2084_p12 = scmp.lt.s32.totalorder %s2404_s12, %s2082_s26 }
  0x3d   : > { %p2079_p8 = pnand %p2077_p6, %p2063_p3  ;;  %p2085_p10 = scmp.lt.s32.totalorder %s2083_s9, %s2076_s17 }
  0x3f   : > { %p2080_p2 = pneg %p2079_p8  ;;  %p2086_p11 = por %p2085_p10, %p2084_p12 }
  0x41   : > { %p2087_p13 = pnand %p2086_p11, %p2080_p2 }
  0x43   : > { %2090 = shalt.err (!%p2087_p13)
}
  0x44   : > { %s2250_s18 = smov 256   ;;  %s2251_s20 = smov 128  }
  0x45   : > { %s2252_s15 = smov 8   ;;  %s2880_s17 = scalar_lea.sflag [#allocation5], %s2395_s8 }
  0x46   : > { %1871 = dma.hbm_to_vmem [thread:$0]  (!%p2409_p4), %s2418_s13, 2048, %s2404_s12, %s2880_s17, %s2250_s18, %s2251_s20, %s2252_s15  }
  0x47   : > { %p301_p12 = scmp.lt.s32.totalorder %s2247_s7, 9  ;;  %s2881_s14 = sshll.u32 %s2402_s11, 6 }
  0x48   : > { %s2458_s2 = scalar_lea.hbm %s2849_s3, %s2881_s14  ;;  %p2882_p2 = scmp.ge.s32.totalorder %s2247_s7, 1 }
  0x49   : > { %s2884_s29 = sshll.u32 %s2395_s8, 7  ;;  %s280_s11 = scalar_lea.sflag [#allocation8], %s2395_s8 }
  0x4a   : > { %p2462_p5 = pnand %p2882_p2, %p301_p12  ;;  %s283_s23 = scalar_lea.vmem [#allocation7], %s2884_s29 }
  0x4b   : > { %s293_s10 = sshll.u32 %s283_s23, 4  ;;  %s2091_s13 = scalar_lea.hbm %s2458_s2, 2048  ;;  %s2468_s10 = int_to_ptr.vmem [resolvable:$true] %s293_s10 }
  0x4c   : > { %p2092_p9 = scmp.ne.s32.totalorder %s2458_s2, %s2091_s13  ;;  %s2096_s14 = scalar_lea.hbm %s2849_s3, 16384 }
  0x4d   : > { %p2097_p6 = scmp.lt.u32.totalorder %s2458_s2, %s2849_s3  ;;  %p2098_p8 = scmp.lt.u32.totalorder %s2096_s14, %s2091_s13 }
  0x4e   : > { %p2094_p0 = pnand %p2092_p9, %p2063_p3  ;;  %p2100_p11 = scmp.lt.u32.totalorder %s2091_s13, %s2458_s2 }
  0x4f   : > { %p2099_p10 = por %p2098_p8, %p2097_p6 }
  0x50   : > { %p2095_p1 = pneg %p2094_p0 }
  0x51   : > { %p2101_p13 = por %p2100_p11, %p2099_p10 }
  0x53   : > { %p2102_p12 = pnand %p2101_p13, %p2095_p1 }
  0x55   : > { %2105 = shalt.err (!%p2102_p12)
}
  0x56   : > { %s2106_s23 = scalar_lea.vmem %s2468_s10, 2048  ;;  %s2253_s29 = smov [#allocation7]  }
  0x57   : > { %p2107_p2 = scmp.ne.s32.totalorder %s2468_s10, %s2106_s23  ;;  %s2111_s12 = sshll.u32 %s2253_s29, 4  ;;  %s2112_s12 = int_to_ptr.vmem [resolvable:$false] %s2111_s12 }
  0x58   : > { %s2113_s17 = scalar_lea.vmem %s2112_s12, 4096  ;;  %p2114_p7 = scmp.lt.s32.totalorder %s2468_s10, %s2112_s12 }
  0x59   : > { %p2109_p9 = pnand %p2107_p2, %p2063_p3  ;;  %p2115_p6 = scmp.lt.s32.totalorder %s2113_s17, %s2106_s23 }
  0x5b   : > { %p2110_p0 = pneg %p2109_p9  ;;  %p2116_p8 = por %p2115_p6, %p2114_p7 }
  0x5d   : > { %p2117_p10 = pnand %p2116_p8, %p2110_p0 }
  0x5f   : > { %2120 = shalt.err (!%p2117_p10)
}
  0x60   : > { %1874 = dma.hbm_to_vmem [thread:$0]  (!%p2409_p4), %s2458_s2, 2048, %s2468_s10, %s280_s11, %s2250_s18, %s2251_s20, %s2252_s15  }
  0x61   : > { %305 = sbr.rel (%p2462_p5) target bundleno = 808 (0x328), region = 44  ;;  %s307_s13 = sand.u32 (!%p2462_p5), 1, %s2223_s25  }
  0x62   : > { %s1616_s14 = sshll.u32 (!%p2462_p5), %s307_s13, 7  ;;  %s308_s26 = scalar_lea.sflag (!%p2462_p5), [#allocation5], %s307_s13 }
  0x63   : > { %s2502_s9 = scalar_lea.vmem (!%p2462_p5), [#allocation4], %s1616_s14  ;;  %p2885_p7 = scmp.ne.s32.totalorder (!%p2462_p5), %s2872_s16, 0 }
  0x68   : > { %2194 = dma.done.wait (%p2885_p7), %s308_s26, 2048  }
  0x69   : > { %2196 = vsyncadd (%p2885_p7), %s308_s26, 4294965248  ;;  %s317_s24 = scalar_lea.sflag [#allocation8], %s307_s13  ;;  %s2508_s8 = scalar_lea.vmem [#allocation7], %s1616_s14 }
  0x6a   : > { %2198 = dma.done.wait (%p2885_p7), %s317_s24, 2048  }
  0x6b   : > { %2200 = vsyncadd (%p2885_p7), %s317_s24, 4294965248  ;;  %s361_s2 = sand.u32 1, %s2211_s22   ;;  %s1619_s30 = sshll.u32 %s2235_s28, 4 }
  0x6c   : > { %s1618_s10 = sshll.u32 %s361_s2, 7  ;;  %p365_p4 = scmp.lt.s32.totalorder %s1619_s30, 63 }
  0x6d   : > { %s1621_s18 = sshll.u32 %s2231_s27, 5  ;;  %s2529_s13 = scalar_lea.vmem [#allocation9], %s1618_s10 }
  0x6e   : > { %s2908_s30 = smov (!%p365_p4, %s1619_s30), 63  ;;  %p371_p3 = scmp.lt.s32.totalorder %s1621_s18, 63 }
  0x6f   : > { %s1620_s20 = sshll.u32 %s2908_s30, 2  ;;  %p1623_p5 = scmp.ne.s32.totalorder %s2231_s27, 0 }
  0x70   : > { %s2522_s23 = scalar_lea.vmem %s2846_s0, %s1620_s20  ;;  %s2910_s18 = smov (!%p371_p3, %s1621_s18), 63  ;;  %vm386_vm0 = vcmask (!%p1623_p5), 523264   ;;  %v2254_v0 = vmov (!%p1623_p5), 0.0  }
  0x71   : > { %s1622_s16 = sshll.u32 %s2910_s18, 2  ;;  %385 = sbr.rel (%p1623_p5) target bundleno = 129 (0x81), region = 56  ;;  %387 = vst.msk [vmem:[#allocation2] sm:$0xff] (!%p1623_p5), %vm386_vm0, %v2254_v0  ;;  %388 = vst.msk [vmem:[#allocation2 + $0x8] sm:$0xff] (!%p1623_p5), %vm386_vm0, %v2254_v0 }
  0x72   : > { %s2527_s17 = scalar_lea.vmem %s2847_s1, %s1622_s16  ;;  %389 = vst.msk [vmem:[#allocation2 + $0x10] sm:$0xff] (!%p1623_p5), %vm386_vm0, %v2254_v0  ;;  %390 = vst.msk [vmem:[#allocation2 + $0x18] sm:$0xff] (!%p1623_p5), %vm386_vm0, %v2254_v0 }
  0x73   : > { %391 = vst.msk [vmem:[#allocation2 + $0x20] sm:$0xff] (!%p1623_p5), %vm386_vm0, %v2254_v0  ;;  %392 = vst.msk [vmem:[#allocation2 + $0x28] sm:$0xff] (!%p1623_p5), %vm386_vm0, %v2254_v0 }
  0x74   : > { %393 = vst.msk [vmem:[#allocation2 + $0x30] sm:$0xff] (!%p1623_p5), %vm386_vm0, %v2254_v0  ;;  %394 = vst.msk [vmem:[#allocation2 + $0x38] sm:$0xff] (!%p1623_p5), %vm386_vm0, %v2254_v0 }
  0x75   : > { %395 = vst.msk [vmem:[#allocation2 + $0x40] sm:$0xff] (!%p1623_p5), %vm386_vm0, %v2254_v0  ;;  %396 = vst.msk [vmem:[#allocation2 + $0x48] sm:$0xff] (!%p1623_p5), %vm386_vm0, %v2254_v0 }
  0x76   : > { %397 = vst.msk [vmem:[#allocation2 + $0x50] sm:$0xff] (!%p1623_p5), %vm386_vm0, %v2254_v0  ;;  %398 = vst.msk [vmem:[#allocation2 + $0x58] sm:$0xff] (!%p1623_p5), %vm386_vm0, %v2254_v0 }
  0x77   : > { %399 = vst.msk [vmem:[#allocation2 + $0x60] sm:$0xff] (!%p1623_p5), %vm386_vm0, %v2254_v0  ;;  %400 = vst.msk [vmem:[#allocation2 + $0x68] sm:$0xff] (!%p1623_p5), %vm386_vm0, %v2254_v0 }
  0x78   : > { %401 = vst.msk [vmem:[#allocation2 + $0x70] sm:$0xff] %vm386_vm0, %v2254_v0  ;;  %402 = vst.msk [vmem:[#allocation2 + $0x78] sm:$0xff] %vm386_vm0, %v2254_v0 }
  0x79   : > { %403 = vst.msk [vmem:[#allocation3] sm:$0xff] %vm386_vm0, %v2254_v0  ;;  %404 = vst.msk [vmem:[#allocation3 + $0x8] sm:$0xff] %vm386_vm0, %v2254_v0 }
  0x7a   : > { %405 = vst.msk [vmem:[#allocation3 + $0x10] sm:$0xff] %vm386_vm0, %v2254_v0  ;;  %406 = vst.msk [vmem:[#allocation3 + $0x18] sm:$0xff] %vm386_vm0, %v2254_v0 }
  0x7b   : > { %407 = vst.msk [vmem:[#allocation3 + $0x20] sm:$0xff] %vm386_vm0, %v2254_v0  ;;  %408 = vst.msk [vmem:[#allocation3 + $0x28] sm:$0xff] %vm386_vm0, %v2254_v0 }
  0x7c   : > { %409 = vst.msk [vmem:[#allocation3 + $0x30] sm:$0xff] %vm386_vm0, %v2254_v0  ;;  %410 = vst.msk [vmem:[#allocation3 + $0x38] sm:$0xff] %vm386_vm0, %v2254_v0 }
  0x7d   : > { %411 = vst.msk [vmem:[#allocation3 + $0x40] sm:$0xff] %vm386_vm0, %v2254_v0  ;;  %412 = vst.msk [vmem:[#allocation3 + $0x48] sm:$0xff] %vm386_vm0, %v2254_v0 }
  0x7e   : > { %413 = vst.msk [vmem:[#allocation3 + $0x50] sm:$0xff] %vm386_vm0, %v2254_v0  ;;  %414 = vst.msk [vmem:[#allocation3 + $0x58] sm:$0xff] %vm386_vm0, %v2254_v0 }
  0x7f   : > { %415 = vst.msk [vmem:[#allocation3 + $0x60] sm:$0xff] %vm386_vm0, %v2254_v0  ;;  %416 = vst.msk [vmem:[#allocation3 + $0x68] sm:$0xff] %vm386_vm0, %v2254_v0 }
  0x80   : > { %417 = vst.msk [vmem:[#allocation3 + $0x70] sm:$0xff] %vm386_vm0, %v2254_v0  ;;  %418 = vst.msk [vmem:[#allocation3 + $0x78] sm:$0xff] %vm386_vm0, %v2254_v0 }
  0x81 PF: > { %v1977_v1 = vld [vmem:[%s2527_s17 + $0x40] sm:$0xff]   ;;  %v1979_v3 = vld [vmem:[%s2527_s17 + $0x48] sm:$0xff]   ;;  %v1981_v5 = vld [vmem:[%s2527_s17 + $0x50] sm:$0xff]   ;;  %vm772_vm1 = vcmask 523264   ;;  %p1672_p1 = scmp.ne.s32.totalorder %s2231_s27, 1 }
  0x82   : > { %v1978_v2 = vld [vmem:[%s2527_s17] sm:$0xff]   ;;  %1710 = vmatprep.subr.bf16.mxu0 %v1977_v1  ;;  %1774 = vmatprep.subr.bf16.mxu1 %v1977_v1  ;;  %v1980_v4 = vld [vmem:[%s2527_s17 + $0x8] sm:$0xff]   ;;  %v1982_v6 = vld [vmem:[%s2527_s17 + $0x10] sm:$0xff]   ;;  %s2256_s14 = smov (!%p1672_p1), 64  }
  0x83   : > { %1711 = vmatpush3.bf16.msra.mxu0 %v1978_v2  ;;  %1775 = vmatpush3.bf16.msra.mxu1 %v1978_v2  ;;  %v1983_v7 = vld [vmem:[%s2527_s17 + $0x58] sm:$0xff]   ;;  %v1985_v9 = vld [vmem:[%s2527_s17 + $0x60] sm:$0xff]   ;;  %v1987_v11 = vld [vmem:[%s2527_s17 + $0x68] sm:$0xff]  }
  0x84   : > { %1712 = vmatprep.subr.bf16.mxu0 %v1979_v3  ;;  %1776 = vmatprep.subr.bf16.mxu1 %v1979_v3  ;;  %v1984_v8 = vld [vmem:[%s2527_s17 + $0x18] sm:$0xff]   ;;  %v1986_v10 = vld [vmem:[%s2527_s17 + $0x20] sm:$0xff]   ;;  %v1988_v14 = vld [vmem:[%s2527_s17 + $0x28] sm:$0xff]  }
  0x85   : > { %v1995_v12 = vld [vmem:[%s2502_s9 + $0x4] ss:$8 sps:$4 sm:$0xff]   ;;  %v1989_v15 = vld [vmem:[%s2527_s17 + $0x70] sm:$0xff]   ;;  %v1991_v17 = vld [vmem:[%s2527_s17 + $0x78] sm:$0xff]  }
  0x86   : > { %v1998_v13 = vld [vmem:[%s2508_s8 + $0x4] ss:$8 sps:$4 sm:$0xff]   ;;  %691 = vmatprep.mubr.bf16.mxu0 %v1995_v12  ;;  %v1990_v16 = vld [vmem:[%s2527_s17 + $0x30] sm:$0xff]   ;;  %v1992_v18 = vld [vmem:[%s2527_s17 + $0x38] sm:$0xff]  }
  0x87   : > { %1713 = vmatpush3.bf16.msra.mxu0 %v1980_v4  ;;  %1777 = vmatpush3.bf16.msra.mxu1 %v1980_v4  ;;  %v1993_v19 = vld [vmem:[%s2502_s9] ss:$8 sps:$4 sm:$0xff]   ;;  %v1999_v21 = vld [vmem:[%s2502_s9 + $0x14] ss:$8 sps:$4 sm:$0xff]   ;;  %v2003_v23 = vld [vmem:[%s2502_s9 + $0x10] ss:$8 sps:$4 sm:$0xff]  }
  0x88   : > { %1714 = vmatprep.subr.bf16.mxu0 %v1981_v5  ;;  %1778 = vmatprep.subr.bf16.mxu1 %v1981_v5  ;;  %v1996_v20 = vld [vmem:[%s2508_s8] ss:$8 sps:$4 sm:$0xff]   ;;  %v2001_v22 = vld [vmem:[%s2508_s8 + $0x14] ss:$8 sps:$4 sm:$0xff]   ;;  %v2004_v24 = vld [vmem:[%s2508_s8 + $0x10] ss:$8 sps:$4 sm:$0xff]  }
  0x89   : > { %933 = vmatprep.mubr.bf16.mxu1 %v1998_v13  ;;  %v2005_v25 = vld [vmem:[%s2502_s9 + $0x24] ss:$8 sps:$4 sm:$0xff]   ;;  %v2009_v27 = vld [vmem:[%s2502_s9 + $0x20] ss:$8 sps:$4 sm:$0xff]   ;;  %v2011_v29 = vld [vmem:[%s2502_s9 + $0x34] ss:$8 sps:$4 sm:$0xff]  }
  0x8a   : > { %v2007_v26 = vld [vmem:[%s2508_s8 + $0x24] ss:$8 sps:$4 sm:$0xff]   ;;  %v2010_v28 = vld [vmem:[%s2508_s8 + $0x20] ss:$8 sps:$4 sm:$0xff]   ;;  %v2013_v30 = vld [vmem:[%s2508_s8 + $0x34] ss:$8 sps:$4 sm:$0xff]  }
  0x8b   : > { %1715 = vmatpush3.bf16.msra.mxu0 %v1982_v6  ;;  %1779 = vmatpush3.bf16.msra.mxu1 %v1982_v6  ;;  %v2015_v31 = vld [vmem:[%s2502_s9 + $0x30] ss:$8 sps:$4 sm:$0xff]   ;;  %v2017_v33 = vld [vmem:[%s2502_s9 + $0x44] ss:$8 sps:$4 sm:$0xff]   ;;  %v2021_v35 = vld [vmem:[%s2502_s9 + $0x40] ss:$8 sps:$4 sm:$0xff]  }
  0x8c   : > { %1716 = vmatprep.subr.bf16.mxu0 %v1983_v7  ;;  %1780 = vmatprep.subr.bf16.mxu1 %v1983_v7  ;;  %v2016_v32 = vld [vmem:[%s2508_s8 + $0x30] ss:$8 sps:$4 sm:$0xff]   ;;  %v2019_v34 = vld [vmem:[%s2508_s8 + $0x44] ss:$8 sps:$4 sm:$0xff]   ;;  %v2022_v36 = vld [vmem:[%s2508_s8 + $0x40] ss:$8 sps:$4 sm:$0xff]  }
  0x8d   : > { %v2023_v37 = vld [vmem:[%s2502_s9 + $0x54] ss:$8 sps:$4 sm:$0xff]   ;;  %v2027_v39 = vld [vmem:[%s2502_s9 + $0x50] ss:$8 sps:$4 sm:$0xff]   ;;  %v2029_v41 = vld [vmem:[%s2502_s9 + $0x64] ss:$8 sps:$4 sm:$0xff]  }
  0x8e   : > { %v2025_v38 = vld [vmem:[%s2508_s8 + $0x54] ss:$8 sps:$4 sm:$0xff]   ;;  %v2028_v40 = vld [vmem:[%s2508_s8 + $0x50] ss:$8 sps:$4 sm:$0xff]   ;;  %v2031_v42 = vld [vmem:[%s2508_s8 + $0x64] ss:$8 sps:$4 sm:$0xff]  }
  0x8f   : > { %1717 = vmatpush3.bf16.msra.mxu0 %v1984_v8  ;;  %1781 = vmatpush3.bf16.msra.mxu1 %v1984_v8  ;;  %v2033_v43 = vld [vmem:[%s2502_s9 + $0x60] ss:$8 sps:$4 sm:$0xff]   ;;  %v2035_v45 = vld [vmem:[%s2502_s9 + $0x74] ss:$8 sps:$4 sm:$0xff]   ;;  %v2039_v47 = vld [vmem:[%s2502_s9 + $0x70] ss:$8 sps:$4 sm:$0xff]  }
  0x90   : > { %1718 = vmatprep.subr.bf16.mxu0 %v1985_v9  ;;  %1782 = vmatprep.subr.bf16.mxu1 %v1985_v9  ;;  %v2034_v44 = vld [vmem:[%s2508_s8 + $0x60] ss:$8 sps:$4 sm:$0xff]   ;;  %v2037_v46 = vld [vmem:[%s2508_s8 + $0x74] ss:$8 sps:$4 sm:$0xff]   ;;  %v2040_v48 = vld [vmem:[%s2508_s8 + $0x70] ss:$8 sps:$4 sm:$0xff]  }
  0x91   : > { %v451_v51 = vld [vmem:[#allocation2] sm:$0xff]  ;;  %v452_v59 = vld [vmem:[#allocation2 + $0x8] sm:$0xff]  ;;  %v453_v7 = vld [vmem:[#allocation2 + $0x10] sm:$0xff] }
  0x92   : > { %v789_v53 = vld [vmem:[#allocation3] sm:$0xff]  ;;  %v790_v61 = vld [vmem:[#allocation3 + $0x8] sm:$0xff]  ;;  %v791_v9 = vld [vmem:[#allocation3 + $0x10] sm:$0xff] }
  0x93   : > { %1719 = vmatpush3.bf16.msra.mxu0 %v1986_v10  ;;  %1783 = vmatpush3.bf16.msra.mxu1 %v1986_v10 }
  0x94   : > { %1720 = vmatprep.subr.bf16.mxu0 %v1987_v11  ;;  %1784 = vmatprep.subr.bf16.mxu1 %v1987_v11 }
  0x97   : > { %1721 = vmatpush3.bf16.msra.mxu0 %v1988_v14  ;;  %1785 = vmatpush3.bf16.msra.mxu1 %v1988_v14 }
  0x98   : > { %1722 = vmatprep.subr.bf16.mxu0 %v1989_v15  ;;  %1786 = vmatprep.subr.bf16.mxu1 %v1989_v15  ;;  %v454_v15 = vld [vmem:[#allocation2 + $0x18] sm:$0xff] }
  0x9b   : > { %1723 = vmatpush3.bf16.msra.mxu0 %v1990_v16  ;;  %1787 = vmatpush3.bf16.msra.mxu1 %v1990_v16 }
  0x9c   : > { %1724 = vmatprep.subr.bf16.mxu0 %v1991_v17  ;;  %1788 = vmatprep.subr.bf16.mxu1 %v1991_v17  ;;  %v792_v17 = vld [vmem:[#allocation3 + $0x18] sm:$0xff] }
  0x9f   : > { %1725 = vmatpush3.bf16.msra.mxu0 %v1992_v18  ;;  %1789 = vmatpush3.bf16.msra.mxu1 %v1992_v18 }
  0xa2   : > { %692 = vmatmul.mubr.bf16.vlgmr.msra.gmra.mrb[0].mxu0 %v1993_v19  ;;  %934 = vmatmul.mubr.bf16.vlgmr.msra.gmra.mrb[0].mxu1 %v1996_v20 }
  0xa3   : > { %699 = vmatprep.mubr.bf16.mxu0 %v1999_v21  ;;  %941 = vmatprep.mubr.bf16.mxu1 %v2001_v22 }
  0xaa   : > { %700 = vmatmul.mubr.bf16.gmra.mrb[4].mxu0 %v2003_v23  ;;  %942 = vmatmul.mubr.bf16.gmra.mrb[4].mxu1 %v2004_v24 }
  0xab   : > { %707 = vmatprep.mubr.bf16.mxu0 %v2005_v25  ;;  %949 = vmatprep.mubr.bf16.mxu1 %v2007_v26 }
  0xb2   : > { %708 = vmatmul.mubr.bf16.gmra.mrb[8].mxu0 %v2009_v27  ;;  %950 = vmatmul.mubr.bf16.gmra.mrb[8].mxu1 %v2010_v28  ;;  %v455_v27 = vld [vmem:[#allocation2 + $0x20] sm:$0xff] }
  0xb3   : > { %715 = vmatprep.mubr.bf16.mxu0 %v2011_v29  ;;  %957 = vmatprep.mubr.bf16.mxu1 %v2013_v30  ;;  %v793_v29 = vld [vmem:[#allocation3 + $0x20] sm:$0xff] }
  0xba   : > { %716 = vmatmul.mubr.bf16.gmra.mrb[12].mxu0 %v2015_v31  ;;  %958 = vmatmul.mubr.bf16.gmra.mrb[12].mxu1 %v2016_v32 }
  0xbb   : > { %723 = vmatprep.mubr.bf16.mxu0 %v2017_v33  ;;  %965 = vmatprep.mubr.bf16.mxu1 %v2019_v34 }
  0xc2   : > { %724 = vmatmul.mubr.bf16.gmra.mrb[16].mxu0 %v2021_v35  ;;  %966 = vmatmul.mubr.bf16.gmra.mrb[16].mxu1 %v2022_v36  ;;  %v456_v35 = vld [vmem:[#allocation2 + $0x28] sm:$0xff] }
  0xc3   : > { %731 = vmatprep.mubr.bf16.mxu0 %v2023_v37  ;;  %973 = vmatprep.mubr.bf16.mxu1 %v2025_v38  ;;  %v794_v37 = vld [vmem:[#allocation3 + $0x28] sm:$0xff] }
  0xca   : > { %732 = vmatmul.mubr.bf16.gmra.mrb[20].mxu0 %v2027_v39  ;;  %974 = vmatmul.mubr.bf16.gmra.mrb[20].mxu1 %v2028_v40 }
  0xcb   : > { %739 = vmatprep.mubr.bf16.mxu0 %v2029_v41  ;;  %981 = vmatprep.mubr.bf16.mxu1 %v2031_v42 }
  0xd2   : > { %740 = vmatmul.mubr.bf16.gmra.mrb[24].mxu0 %v2033_v43  ;;  %982 = vmatmul.mubr.bf16.gmra.mrb[24].mxu1 %v2034_v44 }
  0xd3   : > { %747 = vmatprep.mubr.bf16.mxu0 %v2035_v45  ;;  %989 = vmatprep.mubr.bf16.mxu1 %v2037_v46 }
  0xda   : > { %748 = vmatmul.mubr.bf16.gmra.mrb[28].mxu0 %v2039_v47  ;;  %990 = vmatmul.mubr.bf16.gmra.mrb[28].mxu1 %v2040_v48  ;;  %v457_v47 = vld [vmem:[#allocation2 + $0x30] sm:$0xff] }
 0x175   : > { %v1726_v49 = vpop.f32.mrb[0].mxu0  ;;  %v1790_v50 = vpop.f32.mrb[0].mxu1 }
 0x176   : > { %v1727_v52 = vpop.f32.mrb[1].mxu0  ;;  %v1791_v54 = vpop.f32.mrb[1].mxu1 }
 0x177   : > { %v1728_v55 = vadd.f32 %v1727_v52, %v1726_v49  ;;  %v1792_v56 = vadd.f32 %v1791_v54, %v1790_v50  ;;  %v1729_v57 = vpop.f32.mrb[2].mxu0  ;;  %v1793_v58 = vpop.f32.mrb[2].mxu1  ;;  %v795_v49 = vld [vmem:[#allocation3 + $0x30] sm:$0xff] }
 0x178   : > { %v1730_v60 = vpop.f32.mrb[3].mxu0  ;;  %v1794_v62 = vpop.f32.mrb[3].mxu1 }
 0x179   : > { %v756_v63 = vadd.f32 %v1728_v55, %v451_v51  ;;  %v998_v0 = vadd.f32 %v1792_v56, %v789_v53  ;;  %v1731_v1 = vadd.f32 %v1730_v60, %v1729_v57  ;;  %v1795_v2 = vadd.f32 %v1794_v62, %v1793_v58  ;;  %v458_v55 = vld [vmem:[#allocation2 + $0x38] sm:$0xff] }
 0x17a   : > { %v796_v57 = vld [vmem:[#allocation3 + $0x38] sm:$0xff] }
 0x17b   : > { %773 = vst.msk [vmem:[#allocation2] sm:$0xff] %vm772_vm1, %v756_v63  ;;  %1014 = vst.msk [vmem:[#allocation3] sm:$0xff] %vm772_vm1, %v998_v0  ;;  %v757_v3 = vadd.f32 %v1731_v1, %v452_v59  ;;  %v999_v4 = vadd.f32 %v1795_v2, %v790_v61 }
 0x17d   : > { %774 = vst.msk [vmem:[#allocation2 + $0x8] sm:$0xff] %vm772_vm1, %v757_v3  ;;  %1015 = vst.msk [vmem:[#allocation3 + $0x8] sm:$0xff] %vm772_vm1, %v999_v4  ;;  %v1732_v5 = vpop.f32.mrb[4].mxu0  ;;  %v1796_v6 = vpop.f32.mrb[4].mxu1  ;;  %v459_v3 = vld [vmem:[#allocation2 + $0x40] sm:$0xff] }
 0x17e   : > { %v1733_v8 = vpop.f32.mrb[5].mxu0  ;;  %v1797_v10 = vpop.f32.mrb[5].mxu1 }
 0x17f   : > { %v1734_v11 = vadd.f32 %v1733_v8, %v1732_v5  ;;  %v1798_v12 = vadd.f32 %v1797_v10, %v1796_v6  ;;  %v1735_v13 = vpop.f32.mrb[6].mxu0  ;;  %v1799_v14 = vpop.f32.mrb[6].mxu1  ;;  %v797_v5 = vld [vmem:[#allocation3 + $0x40] sm:$0xff] }
 0x180   : > { %v1736_v16 = vpop.f32.mrb[7].mxu0  ;;  %v1800_v18 = vpop.f32.mrb[7].mxu1 }
 0x181   : > { %v758_v19 = vadd.f32 %v1734_v11, %v453_v7  ;;  %v1000_v20 = vadd.f32 %v1798_v12, %v791_v9  ;;  %v1737_v21 = vadd.f32 %v1736_v16, %v1735_v13  ;;  %v1801_v22 = vadd.f32 %v1800_v18, %v1799_v14  ;;  %v460_v11 = vld [vmem:[#allocation2 + $0x48] sm:$0xff] }
 0x182   : > { %v798_v13 = vld [vmem:[#allocation3 + $0x48] sm:$0xff] }
 0x183   : > { %775 = vst.msk [vmem:[#allocation2 + $0x10] sm:$0xff] %vm772_vm1, %v758_v19  ;;  %1016 = vst.msk [vmem:[#allocation3 + $0x10] sm:$0xff] %vm772_vm1, %v1000_v20  ;;  %v759_v23 = vadd.f32 %v1737_v21, %v454_v15  ;;  %v1001_v24 = vadd.f32 %v1801_v22, %v792_v17 }
 0x185   : > { %776 = vst.msk [vmem:[#allocation2 + $0x18] sm:$0xff] %vm772_vm1, %v759_v23  ;;  %1017 = vst.msk [vmem:[#allocation3 + $0x18] sm:$0xff] %vm772_vm1, %v1001_v24  ;;  %v1738_v25 = vpop.f32.mrb[8].mxu0  ;;  %v1802_v26 = vpop.f32.mrb[8].mxu1  ;;  %v461_v23 = vld [vmem:[#allocation2 + $0x50] sm:$0xff] }
 0x186   : > { %v1739_v28 = vpop.f32.mrb[9].mxu0  ;;  %v1803_v30 = vpop.f32.mrb[9].mxu1 }
 0x187   : > { %v1740_v31 = vadd.f32 %v1739_v28, %v1738_v25  ;;  %v1804_v32 = vadd.f32 %v1803_v30, %v1802_v26  ;;  %v1741_v33 = vpop.f32.mrb[10].mxu0  ;;  %v1805_v34 = vpop.f32.mrb[10].mxu1  ;;  %v799_v25 = vld [vmem:[#allocation3 + $0x50] sm:$0xff] }
 0x188   : > { %v1742_v36 = vpop.f32.mrb[11].mxu0  ;;  %v1806_v38 = vpop.f32.mrb[11].mxu1 }
 0x189   : > { %v760_v39 = vadd.f32 %v1740_v31, %v455_v27  ;;  %v1002_v40 = vadd.f32 %v1804_v32, %v793_v29  ;;  %v1743_v41 = vadd.f32 %v1742_v36, %v1741_v33  ;;  %v1807_v42 = vadd.f32 %v1806_v38, %v1805_v34  ;;  %v462_v31 = vld [vmem:[#allocation2 + $0x58] sm:$0xff] }
 0x18a   : > { %v800_v33 = vld [vmem:[#allocation3 + $0x58] sm:$0xff] }
 0x18b   : > { %777 = vst.msk [vmem:[#allocation2 + $0x20] sm:$0xff] %vm772_vm1, %v760_v39  ;;  %1018 = vst.msk [vmem:[#allocation3 + $0x20] sm:$0xff] %vm772_vm1, %v1002_v40  ;;  %v761_v43 = vadd.f32 %v1743_v41, %v456_v35  ;;  %v1003_v44 = vadd.f32 %v1807_v42, %v794_v37 }
 0x18d   : > { %778 = vst.msk [vmem:[#allocation2 + $0x28] sm:$0xff] %vm772_vm1, %v761_v43  ;;  %1019 = vst.msk [vmem:[#allocation3 + $0x28] sm:$0xff] %vm772_vm1, %v1003_v44  ;;  %v1744_v45 = vpop.f32.mrb[12].mxu0  ;;  %v1808_v46 = vpop.f32.mrb[12].mxu1  ;;  %v463_v43 = vld [vmem:[#allocation2 + $0x60] sm:$0xff] }
 0x18e   : > { %v1745_v48 = vpop.f32.mrb[13].mxu0  ;;  %v1809_v50 = vpop.f32.mrb[13].mxu1 }
 0x18f   : > { %v1746_v51 = vadd.f32 %v1745_v48, %v1744_v45  ;;  %v1810_v52 = vadd.f32 %v1809_v50, %v1808_v46  ;;  %v1747_v53 = vpop.f32.mrb[14].mxu0  ;;  %v1811_v54 = vpop.f32.mrb[14].mxu1  ;;  %v801_v45 = vld [vmem:[#allocation3 + $0x60] sm:$0xff] }
 0x190   : > { %v1748_v56 = vpop.f32.mrb[15].mxu0  ;;  %v1812_v58 = vpop.f32.mrb[15].mxu1 }
 0x191   : > { %v762_v59 = vadd.f32 %v1746_v51, %v457_v47  ;;  %v1004_v60 = vadd.f32 %v1810_v52, %v795_v49  ;;  %v1749_v61 = vadd.f32 %v1748_v56, %v1747_v53  ;;  %v1813_v62 = vadd.f32 %v1812_v58, %v1811_v54  ;;  %v464_v51 = vld [vmem:[#allocation2 + $0x68] sm:$0xff] }
 0x192   : > { %v802_v53 = vld [vmem:[#allocation3 + $0x68] sm:$0xff] }
 0x193   : > { %779 = vst.msk [vmem:[#allocation2 + $0x30] sm:$0xff] %vm772_vm1, %v762_v59  ;;  %1020 = vst.msk [vmem:[#allocation3 + $0x30] sm:$0xff] %vm772_vm1, %v1004_v60  ;;  %v763_v63 = vadd.f32 %v1749_v61, %v458_v55  ;;  %v1005_v0 = vadd.f32 %v1813_v62, %v796_v57 }
 0x195   : > { %780 = vst.msk [vmem:[#allocation2 + $0x38] sm:$0xff] %vm772_vm1, %v763_v63  ;;  %1021 = vst.msk [vmem:[#allocation3 + $0x38] sm:$0xff] %vm772_vm1, %v1005_v0  ;;  %v1750_v1 = vpop.f32.mrb[16].mxu0  ;;  %v1814_v2 = vpop.f32.mrb[16].mxu1  ;;  %v465_v63 = vld [vmem:[#allocation2 + $0x70] sm:$0xff] }
 0x196   : > { %v1751_v4 = vpop.f32.mrb[17].mxu0  ;;  %v1815_v6 = vpop.f32.mrb[17].mxu1 }
 0x197   : > { %v1752_v7 = vadd.f32 %v1751_v4, %v1750_v1  ;;  %v1816_v8 = vadd.f32 %v1815_v6, %v1814_v2  ;;  %v1753_v9 = vpop.f32.mrb[18].mxu0  ;;  %v1817_v10 = vpop.f32.mrb[18].mxu1  ;;  %v803_v1 = vld [vmem:[#allocation3 + $0x70] sm:$0xff] }
 0x198   : > { %v1754_v12 = vpop.f32.mrb[19].mxu0  ;;  %v1818_v14 = vpop.f32.mrb[19].mxu1 }
 0x199   : > { %v764_v15 = vadd.f32 %v1752_v7, %v459_v3  ;;  %v1006_v16 = vadd.f32 %v1816_v8, %v797_v5  ;;  %v1755_v17 = vadd.f32 %v1754_v12, %v1753_v9  ;;  %v1819_v18 = vadd.f32 %v1818_v14, %v1817_v10  ;;  %v466_v7 = vld [vmem:[#allocation2 + $0x78] sm:$0xff] }
 0x19a   : > { %v804_v9 = vld [vmem:[#allocation3 + $0x78] sm:$0xff] }
 0x19b   : > { %781 = vst.msk [vmem:[#allocation2 + $0x40] sm:$0xff] %vm772_vm1, %v764_v15  ;;  %1022 = vst.msk [vmem:[#allocation3 + $0x40] sm:$0xff] %vm772_vm1, %v1006_v16  ;;  %v765_v19 = vadd.f32 %v1755_v17, %v460_v11  ;;  %v1007_v20 = vadd.f32 %v1819_v18, %v798_v13  ;;  %v1050_v17 = vld [vmem:[#allocation2] sm:$0xff] (!%p1672_p1)  ;;  %v1051_v18 = vld [vmem:[#allocation2 + $0x8] sm:$0xff] (!%p1672_p1) }
 0x19d   : > { %782 = vst.msk [vmem:[#allocation2 + $0x48] sm:$0xff] %vm772_vm1, %v765_v19  ;;  %1023 = vst.msk [vmem:[#allocation3 + $0x48] sm:$0xff] %vm772_vm1, %v1007_v20  ;;  %v1756_v21 = vpop.f32.mrb[20].mxu0  ;;  %v1820_v22 = vpop.f32.mrb[20].mxu1  ;;  %v1066_v20 = vpack.c.bf16 (!%p1672_p1), %v1051_v18, %v1050_v17 }
 0x19e   : > { %v1757_v24 = vpop.f32.mrb[21].mxu0  ;;  %v1821_v26 = vpop.f32.mrb[21].mxu1 }
 0x19f   : > { %v1758_v27 = vadd.f32 %v1757_v24, %v1756_v21  ;;  %v1822_v28 = vadd.f32 %v1821_v26, %v1820_v22  ;;  %v1759_v29 = vpop.f32.mrb[22].mxu0  ;;  %v1823_v30 = vpop.f32.mrb[22].mxu1  ;;  %v1052_v22 = vld [vmem:[#allocation2 + $0x10] sm:$0xff] (!%p1672_p1)  ;;  %v2255_v24 = vmov (!%p1672_p1), 0   ;;  %1146 = vrot.lane.b32.xlu0 (!%p1672_p1), %v1066_v20, %s2256_s14 }
 0x1a0   : > { %v1760_v32 = vpop.f32.mrb[23].mxu0  ;;  %v1824_v34 = vpop.f32.mrb[23].mxu1  ;;  %1321 = vmatprep.subr.bf16.mxu0 (!%p1672_p1), %v2255_v24  ;;  %1838 = vmatprep.subr.bf16.mxu1 (!%p1672_p1), %v2255_v24 }
 0x1a1   : > { %v766_v35 = vadd.f32 %v1758_v27, %v461_v23  ;;  %v1008_v36 = vadd.f32 %v1822_v28, %v799_v25  ;;  %v1761_v37 = vadd.f32 %v1760_v32, %v1759_v29  ;;  %v1825_v38 = vadd.f32 %v1824_v34, %v1823_v30  ;;  %v1053_v23 = vld [vmem:[#allocation2 + $0x18] sm:$0xff] (!%p1672_p1)  ;;  %v1054_v30 = vld [vmem:[#allocation2 + $0x20] sm:$0xff] (!%p1672_p1)  ;;  %v1056_v34 = vld [vmem:[#allocation2 + $0x30] sm:$0xff] (!%p1672_p1) }
 0x1a2   : > { %v1058_v19 = vld [vmem:[#allocation2 + $0x40] sm:$0xff] (!%p1672_p1)  ;;  %v1067_v25 = vpack.c.bf16 (!%p1672_p1), %v1053_v23, %v1052_v22  ;;  %v1080_v22 = vld [vmem:[#allocation3 + $0x30] sm:$0xff] (!%p1672_p1)  ;;  %v1081_v23 = vld [vmem:[#allocation3 + $0x38] sm:$0xff] (!%p1672_p1) }
 0x1a3   : > { %783 = vst.msk [vmem:[#allocation2 + $0x50] sm:$0xff] %vm772_vm1, %v766_v35  ;;  %1024 = vst.msk [vmem:[#allocation3 + $0x50] sm:$0xff] %vm772_vm1, %v1008_v36  ;;  %v767_v39 = vadd.f32 %v1761_v37, %v462_v31  ;;  %v1009_v40 = vadd.f32 %v1825_v38, %v800_v33  ;;  %v1055_v31 = vld [vmem:[#allocation2 + $0x28] sm:$0xff] (!%p1672_p1)  ;;  %v1057_v35 = vld [vmem:[#allocation2 + $0x38] sm:$0xff] (!%p1672_p1) }
 0x1a4   : > { %v1059_v21 = vld [vmem:[#allocation2 + $0x48] sm:$0xff] (!%p1672_p1)  ;;  %1148 = vrot.lane.b32.xlu1 (!%p1672_p1), %v1067_v25, %s2256_s14  ;;  %v2041_v36 = vld [vmem:[%s2850_s4] sm:$0xff] (!%p1672_p1)   ;;  %v1068_v37 = vpack.c.bf16 (!%p1672_p1), %v1055_v31, %v1054_v30  ;;  %v2058_v25 = vld [vmem:[%s2522_s23 + $0x30] sm:$0xff] (!%p1672_p1)  }
 0x1a5   : > { %784 = vst.msk [vmem:[#allocation2 + $0x58] sm:$0xff] %vm772_vm1, %v767_v39  ;;  %1025 = vst.msk [vmem:[#allocation3 + $0x58] sm:$0xff] %vm772_vm1, %v1009_v40  ;;  %v1762_v41 = vpop.f32.mrb[24].mxu0  ;;  %v1826_v42 = vpop.f32.mrb[24].mxu1  ;;  %v1070_v28 = vpack.c.bf16 (!%p1672_p1), %v1059_v21, %v1058_v19  ;;  %1322 = vmatpush1.bf16.msra.mxu0 (!%p1672_p1), %v2041_v36  ;;  %v2042_v40 = vld [vmem:[%s2850_s4 + $0x8] sm:$0xff] (!%p1672_p1)   ;;  %1850 = vmatpush1.bf16.msra.mxu1 (!%p1672_p1), %v2041_v36  ;;  %v2057_v19 = vld [vmem:[%s2522_s23 + $0x10] sm:$0xff] (!%p1672_p1)  }
 0x1a6   : > { %v1763_v44 = vpop.f32.mrb[25].mxu0  ;;  %v1827_v46 = vpop.f32.mrb[25].mxu1  ;;  %1323 = vmatprep.subr.bf16.mxu0 (!%p1672_p1), %v2255_v24  ;;  %1839 = vmatprep.subr.bf16.mxu1 (!%p1672_p1), %v2255_v24  ;;  %v2059_v31 = vld [vmem:[%s2522_s23 + $0x18] sm:$0xff] (!%p1672_p1)  }
 0x1a7   : > { %v1764_v47 = vadd.f32 %v1763_v44, %v1762_v41  ;;  %v1828_v48 = vadd.f32 %v1827_v46, %v1826_v42  ;;  %v1765_v49 = vpop.f32.mrb[26].mxu0  ;;  %v1829_v50 = vpop.f32.mrb[26].mxu1  ;;  %1154 = vrot.lane.b32.xlu0 (!%p1672_p1), %v1070_v28, %s2256_s14  ;;  %v1069_v42 = vpack.c.bf16 (!%p1672_p1), %v1057_v35, %v1056_v34  ;;  %v2043_v44 = vld [vmem:[%s2850_s4 + $0x10] sm:$0xff] (!%p1672_p1)   ;;  %v1074_v46 = vld [vmem:[#allocation3] sm:$0xff] (!%p1672_p1)  ;;  %v2060_v35 = vld [vmem:[%s2522_s23 + $0x38] sm:$0xff] (!%p1672_p1)  }
 0x1a8   : > { %v1766_v52 = vpop.f32.mrb[27].mxu0  ;;  %v1830_v54 = vpop.f32.mrb[27].mxu1 }
 0x1a9   : > { %v768_v55 = vadd.f32 %v1764_v47, %v463_v43  ;;  %v1010_v56 = vadd.f32 %v1828_v48, %v801_v45  ;;  %v1767_v57 = vadd.f32 %v1766_v52, %v1765_v49  ;;  %v1831_v58 = vadd.f32 %v1830_v54, %v1829_v50  ;;  %1324 = vmatpush1.bf16.msra.mxu0 (!%p1672_p1), %v2042_v40  ;;  %v2044_v45 = vld [vmem:[%s2850_s4 + $0x18] sm:$0xff] (!%p1672_p1)   ;;  %v1075_v47 = vld [vmem:[#allocation3 + $0x8] sm:$0xff] (!%p1672_p1)  ;;  %v2045_v48 = vld [vmem:[%s2850_s4 + $0x20] sm:$0xff] (!%p1672_p1)  }
 0x1aa   : > { %v1060_v26 = vld [vmem:[#allocation2 + $0x50] sm:$0xff] (!%p1672_p1)  ;;  %1325 = vmatprep.subr.bf16.mxu0 (!%p1672_p1), %v2255_v24  ;;  %1851 = vmatpush1.bf16.msra.mxu1 (!%p1672_p1), %v2042_v40  ;;  %v1090_v49 = vpack.c.bf16 (!%p1672_p1), %v1075_v47, %v1074_v46  ;;  %v1082_v50 = vld [vmem:[#allocation3 + $0x40] sm:$0xff] (!%p1672_p1) }
 0x1ab   : > { %785 = vst.msk [vmem:[#allocation2 + $0x60] sm:$0xff] %vm772_vm1, %v768_v55  ;;  %1026 = vst.msk [vmem:[#allocation3 + $0x60] sm:$0xff] %vm772_vm1, %v1010_v56  ;;  %v769_v59 = vadd.f32 %v1767_v57, %v464_v51  ;;  %v1011_v60 = vadd.f32 %v1831_v58, %v802_v53  ;;  %1150 = vrot.lane.b32.xlu0 (!%p1672_p1), %v1068_v37, %s2256_s14  ;;  %1840 = vmatprep.subr.bf16.mxu1 (!%p1672_p1), %v2255_v24  ;;  %v1083_v51 = vld [vmem:[#allocation3 + $0x48] sm:$0xff] (!%p1672_p1)  ;;  %v2047_v54 = vld [vmem:[%s2850_s4 + $0x30] sm:$0xff] (!%p1672_p1)  }
 0x1ac   : > { %v1061_v27 = vld [vmem:[#allocation2 + $0x58] sm:$0xff] (!%p1672_p1)  ;;  %v1094_v52 = vpack.c.bf16 (!%p1672_p1), %v1083_v51, %v1082_v50  ;;  %1694 = vmatprep.mubr.msk.bf16.mxu0 (!%p1672_p1), %vm772_vm1, %v1090_v49  ;;  %v2046_v53 = vld [vmem:[%s2850_s4 + $0x28] sm:$0xff] (!%p1672_p1)   ;;  %v2049_v56 = vld [vmem:[%s2850_s4 + $0x40] sm:$0xff] (!%p1672_p1)  }
 0x1ad   : > { %786 = vst.msk [vmem:[#allocation2 + $0x68] sm:$0xff] %vm772_vm1, %v769_v59  ;;  %1027 = vst.msk [vmem:[#allocation3 + $0x68] sm:$0xff] %vm772_vm1, %v1011_v60  ;;  %v1768_v61 = vpop.f32.mrb[28].mxu0  ;;  %v1832_v62 = vpop.f32.mrb[28].mxu1  ;;  %v1071_v29 = vpack.c.bf16 (!%p1672_p1), %v1061_v27, %v1060_v26  ;;  %1326 = vmatpush1.bf16.msra.mxu0 (!%p1672_p1), %v2043_v44  ;;  %v2048_v55 = vld [vmem:[%s2850_s4 + $0x38] sm:$0xff] (!%p1672_p1)   ;;  %v2050_v57 = vld [vmem:[%s2850_s4 + $0x48] sm:$0xff] (!%p1672_p1)   ;;  %v1093_v26 = vpack.c.bf16 (!%p1672_p1), %v1081_v23, %v1080_v22 }
 0x1ae   : > { %v1769_v0 = vpop.f32.mrb[29].mxu0  ;;  %v1833_v2 = vpop.f32.mrb[29].mxu1  ;;  %1327 = vmatprep.subr.bf16.mxu0 (!%p1672_p1), %v2255_v24  ;;  %1852 = vmatpush1.bf16.msra.mxu1 (!%p1672_p1), %v2043_v44  ;;  %v2051_v58 = vld [vmem:[%s2850_s4 + $0x50] sm:$0xff] (!%p1672_p1)   ;;  %v2052_v59 = vld [vmem:[%s2850_s4 + $0x58] sm:$0xff] (!%p1672_p1)  }
 0x1af   : > { %v1770_v3 = vadd.f32 %v1769_v0, %v1768_v61  ;;  %v1834_v4 = vadd.f32 %v1833_v2, %v1832_v62  ;;  %v1771_v5 = vpop.f32.mrb[30].mxu0  ;;  %v1835_v6 = vpop.f32.mrb[30].mxu1  ;;  %1033 = sbr.rel (%p1672_p1) target bundleno = 782 (0x30e), region = 60  ;;  %1156 = vrot.lane.b32.xlu1 (!%p1672_p1), %v1071_v29, %s2256_s14  ;;  %1152 = vrot.lane.b32.xlu0 (!%p1672_p1), %v1069_v42, %s2256_s14  ;;  %v1076_v60 = vld [vmem:[#allocation3 + $0x10] sm:$0xff] (!%p1672_p1)  ;;  %v1077_v61 = vld [vmem:[#allocation3 + $0x18] sm:$0xff] (!%p1672_p1)  ;;  %v2053_v62 = vld [vmem:[%s2522_s23] sm:$0xff] (!%p1672_p1)  }
 0x1b0   : > { %v1772_v8 = vpop.f32.mrb[31].mxu0  ;;  %v1836_v10 = vpop.f32.mrb[31].mxu1  ;;  %1841 = vmatprep.subr.bf16.mxu1 (!%p1672_p1), %v2255_v24  ;;  %1698 = vmatprep.mubr.msk.bf16.mxu1 (!%p1672_p1), %vm772_vm1, %v1094_v52  ;;  %v1085_v2 = vld [vmem:[#allocation3 + $0x58] sm:$0xff] (!%p1672_p1) }
 0x1b1   : > { %v770_v11 = vadd.f32 %v1770_v3, %v465_v63  ;;  %v1012_v12 = vadd.f32 %v1834_v4, %v803_v1  ;;  %v1773_v13 = vadd.f32 %v1772_v8, %v1771_v5  ;;  %v1837_v14 = vadd.f32 %v1836_v10, %v1835_v6  ;;  %1328 = vmatpush1.bf16.msra.mxu0 (!%p1672_p1), %v2044_v45  ;;  %v1084_v1 = vld [vmem:[#allocation3 + $0x50] sm:$0xff] (!%p1672_p1)  ;;  %v2054_v4 = vld [vmem:[%s2522_s23 + $0x20] sm:$0xff] (!%p1672_p1)   ;;  %v2055_v6 = vld [vmem:[%s2522_s23 + $0x8] sm:$0xff] (!%p1672_p1)  }
 0x1b2   : > { %v1062_v32 = vld [vmem:[#allocation2 + $0x60] sm:$0xff] (!%p1672_p1)  ;;  %1329 = vmatprep.subr.bf16.mxu0 (!%p1672_p1), %v2255_v24  ;;  %1853 = vmatpush1.bf16.msra.mxu1 (!%p1672_p1), %v2044_v45  ;;  %v1091_v63 = vpack.c.bf16 (!%p1672_p1), %v1077_v61, %v1076_v60  ;;  %v1079_v10 = vld [vmem:[#allocation3 + $0x28] sm:$0xff] (!%p1672_p1) }
 0x1b3   : > { %787 = vst.msk [vmem:[#allocation2 + $0x70] sm:$0xff] %vm772_vm1, %v770_v11  ;;  %1028 = vst.msk [vmem:[#allocation3 + $0x70] sm:$0xff] %vm772_vm1, %v1012_v12  ;;  %v771_v15 = vadd.f32 %v1773_v13, %v466_v7  ;;  %v1013_v16 = vadd.f32 %v1837_v14, %v804_v9  ;;  %1842 = vmatprep.subr.bf16.mxu1 (!%p1672_p1), %v2255_v24  ;;  %v1095_v7 = vpack.c.bf16 (!%p1672_p1), %v1085_v2, %v1084_v1  ;;  %v1078_v9 = vld [vmem:[#allocation3 + $0x20] sm:$0xff] (!%p1672_p1)  ;;  %v2056_v13 = vld [vmem:[%s2522_s23 + $0x28] sm:$0xff] (!%p1672_p1)  }
 0x1b4   : > { %v1063_v33 = vld [vmem:[#allocation2 + $0x68] sm:$0xff] (!%p1672_p1)  ;;  %v1092_v14 = vpack.c.bf16 (!%p1672_p1), %v1079_v10, %v1078_v9 }
 0x1b5   : > { %788 = vst.msk [vmem:[#allocation2 + $0x78] sm:$0xff] %vm772_vm1, %v771_v15  ;;  %1029 = vst.msk [vmem:[#allocation3 + $0x78] sm:$0xff] %vm772_vm1, %v1013_v16  ;;  %v1072_v39 = vpack.c.bf16 (!%p1672_p1), %v1063_v33, %v1062_v32  ;;  %1330 = vmatpush1.bf16.msra.mxu0 (!%p1672_p1), %v2045_v48  ;;  %v1086_v16 = vld [vmem:[#allocation3 + $0x60] sm:$0xff] (!%p1672_p1)  ;;  %v1087_v17 = vld [vmem:[#allocation3 + $0x68] sm:$0xff] (!%p1672_p1) }
 0x1b6   : > { %1331 = vmatprep.subr.bf16.mxu0 %v2255_v24  ;;  %1854 = vmatpush1.bf16.msra.mxu1 %v2045_v48  ;;  %v1096_v20 = vpack.c.bf16 %v1087_v17, %v1086_v16 }
 0x1b7   : > { %1158 = vrot.lane.b32.xlu1 %v1072_v39, %s2256_s14  ;;  %1843 = vmatprep.subr.bf16.mxu1 %v2255_v24 }
 0x1b9   : > { %1332 = vmatpush1.bf16.msra.mxu0 %v2046_v53 }
 0x1ba   : > { %v1064_v38 = vld [vmem:[#allocation2 + $0x70] sm:$0xff]  ;;  %1333 = vmatprep.subr.bf16.mxu0 %v2255_v24  ;;  %1855 = vmatpush1.bf16.msra.mxu1 %v2046_v53 }
 0x1bb   : > { %1844 = vmatprep.subr.bf16.mxu1 %v2255_v24  ;;  %v1088_v28 = vld [vmem:[#allocation3 + $0x70] sm:$0xff] }
 0x1bc   : > { %v1065_v41 = vld [vmem:[#allocation2 + $0x78] sm:$0xff] }
 0x1bd   : > { %v1073_v43 = vpack.c.bf16 %v1065_v41, %v1064_v38  ;;  %1334 = vmatpush1.bf16.msra.mxu0 %v2047_v54  ;;  %v1089_v29 = vld [vmem:[#allocation3 + $0x78] sm:$0xff]  ;;  %v2740_v38 = vld [vmem:[%s2851_s5] ss:$0 sm:$0xff] }
 0x1be   : > { %1335 = vmatprep.subr.bf16.mxu0 %v2255_v24  ;;  %1856 = vmatpush1.bf16.msra.mxu1 %v2047_v54  ;;  %v1097_v32 = vpack.c.bf16 %v1089_v29, %v1088_v28 }
 0x1bf   : > { %1160 = vrot.lane.b32.xlu1 %v1073_v43, %s2256_s14  ;;  %1845 = vmatprep.subr.bf16.mxu1 %v2255_v24 }
 0x1c1   : > { %1336 = vmatpush1.bf16.msra.mxu0 %v2048_v55 }
 0x1c2   : > { %1337 = vmatprep.subr.bf16.mxu0 %v2255_v24  ;;  %1857 = vmatpush1.bf16.msra.mxu1 %v2048_v55 }
 0x1c3   : > { %1846 = vmatprep.subr.bf16.mxu1 %v2255_v24 }
 0x1c5   : > { %1338 = vmatpush1.bf16.msra.mxu0 %v2049_v56 }
 0x1c6   : > { %1339 = vmatprep.subr.bf16.mxu0 %v2255_v24  ;;  %1858 = vmatpush1.bf16.msra.mxu1 %v2049_v56 }
 0x1c7   : > { %1847 = vmatprep.subr.bf16.mxu1 %v2255_v24 }
 0x1c9   : > { %1340 = vmatpush1.bf16.msra.mxu0 %v2050_v57 }
 0x1ca   : > { %1341 = vmatprep.subr.bf16.mxu0 %v2255_v24  ;;  %1859 = vmatpush1.bf16.msra.mxu1 %v2050_v57 }
 0x1cb   : > { %1848 = vmatprep.subr.bf16.mxu1 %v2255_v24 }
 0x1cd   : > { %1342 = vmatpush1.bf16.msra.mxu0 %v2051_v58 }
 0x1ce   : > { %1343 = vmatprep.subr.bf16.mxu0 %v2255_v24  ;;  %1860 = vmatpush1.bf16.msra.mxu1 %v2051_v58 }
 0x1cf   : > { %1849 = vmatprep.subr.bf16.mxu1 %v2255_v24 }
 0x1d1   : > { %1344 = vmatpush1.bf16.msra.mxu0 %v2052_v59 }
 0x1d2   : > { %1861 = vmatpush1.bf16.msra.mxu1 %v2052_v59 }
 0x211   : > { %v1147_v0 = vpop.permute.xlu0 %1146 }
 0x212   : > { %v1164_v3 = vsel %vm772_vm1, %v2053_v62, %v1147_v0 }
 0x213   : > { %1354 = vmatmul.mubr.bf16.vlgmr.msra.gmra.mrb[0].mxu0 %v1164_v3 }
 0x214   : > { %1695 = vmatprep.mubr.msk.bf16.mxu0 %vm772_vm1, %v1091_v63 }
 0x216   : > { %v1149_v5 = vpop.permute.xlu1 %1148 }
 0x217   : > { %v1168_v12 = vsel %vm772_vm1, %v2055_v6, %v1149_v5 }
 0x219   : > { %v1155_v8 = vpop.permute.xlu0 %1154 }
 0x21a   : > { %v1180_v11 = vsel %vm772_vm1, %v2054_v4, %v1155_v8 }
 0x21b   : > { %1386 = vmatmul.mubr.bf16.vlgmr.msra.gmra.mrb[0].mxu1 %v1180_v11  ;;  %1362 = vmatmul.mubr.bf16.gmra.mrb[4].mxu0 %v1168_v12 }
 0x21c   : > { %1699 = vmatprep.mubr.msk.bf16.mxu1 %vm772_vm1, %v1095_v7  ;;  %1696 = vmatprep.mubr.msk.bf16.mxu0 %vm772_vm1, %v1092_v14 }
 0x21d   : > { %v1151_v21 = vpop.permute.xlu0 %1150 }
 0x21e   : > { %v1172_v24 = vsel %vm772_vm1, %v2057_v19, %v1151_v21 }
 0x221   : > { %v1157_v15 = vpop.permute.xlu1 %1156  ;;  %v1153_v33 = vpop.permute.xlu0 %1152 }
 0x222   : > { %v1184_v18 = vsel %vm772_vm1, %v2056_v13, %v1157_v15  ;;  %v1176_v34 = vsel %vm772_vm1, %v2059_v31, %v1153_v33 }
 0x223   : > { %1394 = vmatmul.mubr.bf16.gmra.mrb[4].mxu1 %v1184_v18  ;;  %1370 = vmatmul.mubr.bf16.gmra.mrb[8].mxu0 %v1172_v24 }
 0x224   : > { %1700 = vmatprep.mubr.msk.bf16.mxu1 %vm772_vm1, %v1096_v20  ;;  %1697 = vmatprep.mubr.msk.bf16.mxu0 %vm772_vm1, %v1093_v26 }
 0x229   : > { %v1159_v27 = vpop.permute.xlu1 %1158 }
 0x22a   : > { %v1188_v30 = vsel %vm772_vm1, %v2058_v25, %v1159_v27 }
 0x22b   : > { %1402 = vmatmul.mubr.bf16.gmra.mrb[8].mxu1 %v1188_v30  ;;  %1378 = vmatmul.mubr.bf16.gmra.mrb[12].mxu0 %v1176_v34 }
 0x22c   : > { %1701 = vmatprep.mubr.msk.bf16.mxu1 %vm772_vm1, %v1097_v32 }
 0x231   : > { %v1161_v36 = vpop.permute.xlu1 %1160 }
 0x232   : > { %v1192_v37 = vsel %vm772_vm1, %v2060_v35, %v1161_v36 }
 0x233   : > { %1410 = vmatmul.mubr.bf16.gmra.mrb[12].mxu1 %v1192_v37 }
 0x2e6   : > { %v1355_v39 = vpop.f32.mrb[0].mxu0 }
 0x2e7   : > { %v1356_v40 = vadd.f32 %v2740_v38, %v1355_v39  ;;  %v1357_v41 = vpop.f32.mrb[1].mxu0 }
 0x2e8   : > { %v1358_v42 = vpop.f32.mrb[2].mxu0 }
 0x2e9   : > { %v1418_v43 = vmax.f32 %v1356_v40, 0.0  ;;  %v1359_v44 = vadd.f32 %v2740_v38, %v1358_v42  ;;  %v1360_v45 = vpop.f32.mrb[3].mxu0 }
 0x2eb   : > { %1434 = vst [vmem:[%s2529_s13] sm:$0xff] %v1418_v43  ;;  %v1419_v47 = vmax.f32 %v1359_v44, 0.0 }
 0x2ed   : > { %1435 = vst [vmem:[%s2529_s13 + $0x8] sm:$0xff] %v1419_v47 }
 0x2ee   : > { %v1387_v46 = vpop.f32.mrb[0].mxu1  ;;  %v1363_v54 = vpop.f32.mrb[4].mxu0 }
 0x2ef   : > { %v1388_v48 = vadd.f32 %v2740_v38, %v1387_v46  ;;  %v1389_v49 = vpop.f32.mrb[1].mxu1  ;;  %v1364_v56 = vadd.f32 %v2740_v38, %v1363_v54  ;;  %v1365_v57 = vpop.f32.mrb[5].mxu0 }
 0x2f0   : > { %v1390_v50 = vpop.f32.mrb[2].mxu1  ;;  %v1366_v58 = vpop.f32.mrb[6].mxu0 }
 0x2f1   : > { %v1426_v51 = vmax.f32 %v1388_v48, 0.0  ;;  %v1391_v52 = vadd.f32 %v2740_v38, %v1390_v50  ;;  %v1392_v53 = vpop.f32.mrb[3].mxu1  ;;  %v1420_v59 = vmax.f32 %v1364_v56, 0.0  ;;  %v1367_v60 = vadd.f32 %v2740_v38, %v1366_v58  ;;  %v1368_v61 = vpop.f32.mrb[7].mxu0 }
 0x2f3   : > { %1442 = vst [vmem:[%s2529_s13 + $0x40] sm:$0xff] %v1426_v51  ;;  %v1427_v55 = vmax.f32 %v1391_v52, 0.0  ;;  %1436 = vst [vmem:[%s2529_s13 + $0x10] sm:$0xff] %v1420_v59  ;;  %v1421_v63 = vmax.f32 %v1367_v60, 0.0 }
 0x2f5   : > { %1443 = vst [vmem:[%s2529_s13 + $0x48] sm:$0xff] %v1427_v55  ;;  %1437 = vst [vmem:[%s2529_s13 + $0x18] sm:$0xff] %v1421_v63 }
 0x2f6   : > { %v1395_v62 = vpop.f32.mrb[4].mxu1  ;;  %v1371_v6 = vpop.f32.mrb[8].mxu0 }
 0x2f7   : > { %v1396_v0 = vadd.f32 %v2740_v38, %v1395_v62  ;;  %v1397_v1 = vpop.f32.mrb[5].mxu1  ;;  %v1372_v8 = vadd.f32 %v2740_v38, %v1371_v6  ;;  %v1373_v9 = vpop.f32.mrb[9].mxu0 }
 0x2f8   : > { %v1398_v2 = vpop.f32.mrb[6].mxu1  ;;  %v1374_v10 = vpop.f32.mrb[10].mxu0 }
 0x2f9   : > { %v1428_v3 = vmax.f32 %v1396_v0, 0.0  ;;  %v1399_v4 = vadd.f32 %v2740_v38, %v1398_v2  ;;  %v1400_v5 = vpop.f32.mrb[7].mxu1  ;;  %v1422_v11 = vmax.f32 %v1372_v8, 0.0  ;;  %v1375_v12 = vadd.f32 %v2740_v38, %v1374_v10  ;;  %v1376_v13 = vpop.f32.mrb[11].mxu0 }
 0x2fb   : > { %1444 = vst [vmem:[%s2529_s13 + $0x50] sm:$0xff] %v1428_v3  ;;  %v1429_v7 = vmax.f32 %v1399_v4, 0.0  ;;  %1438 = vst [vmem:[%s2529_s13 + $0x20] sm:$0xff] %v1422_v11  ;;  %v1423_v15 = vmax.f32 %v1375_v12, 0.0 }
 0x2fd   : > { %1445 = vst [vmem:[%s2529_s13 + $0x58] sm:$0xff] %v1429_v7  ;;  %1439 = vst [vmem:[%s2529_s13 + $0x28] sm:$0xff] %v1423_v15 }
 0x2fe   : > { %v1403_v14 = vpop.f32.mrb[8].mxu1  ;;  %v1379_v22 = vpop.f32.mrb[12].mxu0 }
 0x2ff   : > { %v1404_v16 = vadd.f32 %v2740_v38, %v1403_v14  ;;  %v1405_v17 = vpop.f32.mrb[9].mxu1  ;;  %v1380_v24 = vadd.f32 %v2740_v38, %v1379_v22  ;;  %v1381_v25 = vpop.f32.mrb[13].mxu0 }
 0x300   : > { %v1406_v18 = vpop.f32.mrb[10].mxu1  ;;  %v1382_v26 = vpop.f32.mrb[14].mxu0 }
 0x301   : > { %v1430_v19 = vmax.f32 %v1404_v16, 0.0  ;;  %v1407_v20 = vadd.f32 %v2740_v38, %v1406_v18  ;;  %v1408_v21 = vpop.f32.mrb[11].mxu1  ;;  %v1424_v27 = vmax.f32 %v1380_v24, 0.0  ;;  %v1383_v28 = vadd.f32 %v2740_v38, %v1382_v26  ;;  %v1384_v29 = vpop.f32.mrb[15].mxu0 }
 0x303   : > { %1446 = vst [vmem:[%s2529_s13 + $0x60] sm:$0xff] %v1430_v19  ;;  %v1431_v23 = vmax.f32 %v1407_v20, 0.0  ;;  %1440 = vst [vmem:[%s2529_s13 + $0x30] sm:$0xff] %v1424_v27  ;;  %v1425_v31 = vmax.f32 %v1383_v28, 0.0 }
 0x305   : > { %1447 = vst [vmem:[%s2529_s13 + $0x68] sm:$0xff] %v1431_v23  ;;  %1441 = vst [vmem:[%s2529_s13 + $0x38] sm:$0xff] %v1425_v31 }
 0x306   : > { %v1411_v30 = vpop.f32.mrb[12].mxu1 }
 0x307   : > { %v1412_v32 = vadd.f32 %v2740_v38, %v1411_v30  ;;  %v1413_v33 = vpop.f32.mrb[13].mxu1 }
 0x308   : > { %v1414_v34 = vpop.f32.mrb[14].mxu1 }
 0x309   : > { %v1432_v35 = vmax.f32 %v1412_v32, 0.0  ;;  %v1415_v36 = vadd.f32 %v2740_v38, %v1414_v34  ;;  %v1416_v37 = vpop.f32.mrb[15].mxu1 }
 0x30b   : > { %1448 = vst [vmem:[%s2529_s13 + $0x70] sm:$0xff] %v1432_v35  ;;  %v1433_v39 = vmax.f32 %v1415_v36, 0.0 }
 0x30d   : > { %1449 = vst [vmem:[%s2529_s13 + $0x78] sm:$0xff] %v1433_v39 }
 0x30e PF: > { %s1709_s23 = sshll.u32 %s2235_s28, 11  ;;  %s1464_s12 = sshll.u32 %s2529_s13, 4  ;;  %s2781_s12 = int_to_ptr.vmem [resolvable:$true] %s1464_s12 }
 0x30f   : > { %s2778_s29 = scalar_lea.hbm %s2852_s6, %s1709_s23  ;;  %s2785_s17 = scalar_lea.sflag [#allocation6], %s361_s2 }
 0x310   : > { %s2121_s14 = scalar_lea.vmem %s2781_s12, 2048  ;;  %p2886_p13 = scmp.ne.s32.totalorder %s2873_s19, 0 }
 0x311   : > { %p2122_p11 = scmp.ne.s32.totalorder %s2781_s12, %s2121_s14  ;;  %s2257_s28 = smov [#allocation9]  }
 0x312   : > { %s2125_s27 = sshll.u32 %s2257_s28, 4  ;;  %s2126_s27 = int_to_ptr.vmem [resolvable:$false] %s2125_s27 }
 0x313   : > { %p2123_p12 = pnand %p2122_p11, %p2886_p13  ;;  %s2127_s26 = scalar_lea.vmem %s2126_s27, 4096 }
 0x314   : > { %p2128_p9 = scmp.lt.s32.totalorder %s2781_s12, %s2126_s27  ;;  %p2129_p0 = scmp.lt.s32.totalorder %s2127_s26, %s2121_s14 }
 0x315   : > { %p2124_p2 = pneg %p2123_p12 }
 0x316   : > { %p2130_p6 = por %p2129_p0, %p2128_p9 }
 0x318   : > { %p2131_p8 = pnand %p2130_p6, %p2124_p2 }
 0x31a   : > { %2134 = shalt.err (!%p2131_p8)
}
 0x31b   : > { %s2135_s2 = scalar_lea.hbm %s2778_s29, 2048  ;;  %s2139_s24 = scalar_lea.hbm %s2852_s6, 8192 }
 0x31c   : > { %p2136_p10 = scmp.ne.s32.totalorder %s2778_s29, %s2135_s2  ;;  %p2140_p3 = scmp.lt.u32.totalorder %s2778_s29, %s2852_s6 }
 0x31d   : > { %p2141_p5 = scmp.lt.u32.totalorder %s2139_s24, %s2135_s2  ;;  %p2143_p11 = scmp.lt.u32.totalorder %s2135_s2, %s2778_s29 }
 0x31e   : > { %p2137_p7 = pnand %p2136_p10, %p2886_p13 }
 0x31f   : > { %p2142_p1 = por %p2141_p5, %p2140_p3 }
 0x320   : > { %p2138_p4 = pneg %p2137_p7 }
 0x321   : > { %p2144_p12 = por %p2143_p11, %p2142_p1 }
 0x323   : > { %p2145_p2 = pnand %p2144_p12, %p2138_p4 }
 0x325   : > { %2148 = shalt.err (!%p2145_p2)
}
 0x326   : > { %s2258_s10 = smov 128   ;;  %s2259_s18 = smov 8  }
 0x327   : > { %1866 = dma.vmem_to_hbm [thread:$0]  (%p2886_p13), %s2781_s12, 2048, %s2778_s29, %s2785_s17, %s2258_s10, %s2258_s10, %s2259_s18  }
 0x328 PF: > { %s2887_s20 = sld [smem:[#allocation21_spill]]  ;;  %p1880_p9 = scmp.ge.s32.totalorder %s2247_s7, 2 }
 0x329   : > { %s1479_s15 = sand.u32 1, %s2207_s21  }
 0x32a   : > { %s1480_s23 = scalar_lea.sflag [#allocation6], %s1479_s15 }
 0x32e   : > { %p2888_p0 = scmp.ne.s32.totalorder %s2887_s20, 0 }
 0x330   : > { %p1876_p6 = pnand %p1880_p9, %p2888_p0 }
 0x332   : > { %2202 = dma.done.wait (!%p1876_p6), %s1480_s23, 2048  }
 0x333   : > { %2204 = vsyncadd (!%p1876_p6), %s1480_s23, 4294965248  ;;  %s25_s7 = sadd.s32 1, %s2247_s7   ;;  %s2889_s11 = sld [smem:[#allocation13_spill]] }
 0x334   : > { %p22_p8 = scmp.ge.s32.totalorder %s25_s7, 10   ;;  %s2890_s23 = sld [smem:[#allocation19_spill]] }
 0x335   : > { %s2891_s19 = sld [smem:[#allocation14_spill]]  ;;  %s2892_s26 = sld [smem:[#allocation20_spill]] }
 0x336   : > { %s2893_s27 = sld [smem:[#allocation15_spill]]  ;;  %s2894_s28 = sld [smem:[#allocation16_spill]] }
 0x337   : > { %s2895_s29 = sld [smem:[#allocation17_spill]]  ;;  %s2896_s30 = sld [smem:[#allocation18_spill]] }
 0x338   : > { %s2897_s21 = smov %s2211_s22  ;;  %s2899_s24 = smov %s2223_s25 }
 0x339   : > { %s2898_s22 = smov %s2889_s11  ;;  %24 = sbr.rel (!%p22_p8) target bundleno = 13 (0xd), region = 116 }
 0x33b   : > { %s2900_s25 = smov %s2891_s19 }
 0x340   :  { %1485 = vsyncpa [#allocation5], 1 }
 0x341   :  { %1487 = vsyncpa [#allocation5 + $0x1], 1 }
 0x342   :  { %1488 = vsyncpa [#allocation8], 1 }
 0x343   :  { %1490 = vsyncpa [#allocation8 + $0x1], 1 }
 0x344   :  { %1491 = vsyncpa [#allocation6], 1 }
 0x345   :  { %1493 = vsyncpa [#allocation6 + $0x1], 1 }

</bundles_post_ra>
